<compile_context>
chip_gen: v5e
topology: v5e:2x2
jax: 0.10.0
libtpu: 0.0.40
codegen_flags: <defaults>
</compile_context>

<pallas_src>
import jax
import jax.numpy as jnp
from jax.experimental import pallas as pl
from jax.experimental.pallas import tpu as pltpu


# ----------------------------------------------------------------------------
# helpers
# ----------------------------------------------------------------------------
def round_up(x, m):
    return ((x + m - 1) // m) * m


def pad_to(arr, shape):
    pads = [(0, s - d) for d, s in zip(arr.shape, shape)]
    return jnp.pad(arr, pads)


def _divisor_tile(n_pad, max_tile):
    """Largest multiple of 128 that divides n_pad, capped at max_tile."""
    t = min(max_tile, n_pad)
    t = max(128, (t // 128) * 128)
    while n_pad % t != 0:
        t -= 128
    return t


def pick_tiles(n_pad, max_tile=512):
    """Adaptive (tm, tk): big tiles for DMA efficiency, but >= 2 row tiles when
    possible so the megacore-parallel row axis keeps both v7x TCs busy."""
    tk = _divisor_tile(n_pad, max_tile)
    tm = _divisor_tile(n_pad, min(max_tile, max(128, n_pad // 2)))
    return tm, tk


# ----------------------------------------------------------------------------
# fused GCNConv layer kernel:  out = act(A_hat @ (X @ W) + b)
#   grid = (N_pad // tm, N_pad // tk); W (Kdim x Nc) and bias stay resident.
# ----------------------------------------------------------------------------
def _make_gcn_layer_kernel(apply_sigmoid):
    def kernel(a_ref, x_ref, w_ref, b_ref, o_ref, acc_ref):
        k = pl.program_id(1)

        @pl.when(k == 0)
        def _():
            acc_ref[...] = jnp.zeros_like(acc_ref)

        # Feature transform for this k-slab of nodes (W resident), then aggregate.
        xw = jnp.dot(x_ref[...], w_ref[...], preferred_element_type=jnp.float32)
        acc_ref[...] += jnp.dot(a_ref[...], xw.astype(jnp.bfloat16),
                                preferred_element_type=jnp.float32)

        @pl.when(k == pl.num_programs(1) - 1)
        def _():
            r = acc_ref[...] + b_ref[...]
            if apply_sigmoid:
                r = jax.nn.sigmoid(r)
            o_ref[...] = r.astype(o_ref.dtype)

    return kernel


def gcn_layer(a_hat, x, w, b, *, sigmoid, tm, tk):
    N_pad = a_hat.shape[0]
    Kdim = x.shape[1]
    Nc = w.shape[1]
    grid = (N_pad // tm, N_pad // tk)

    cost = pl.CostEstimate(
        flops=2 * N_pad * N_pad * Nc + 2 * grid[0] * N_pad * Kdim * Nc,
        transcendentals=(N_pad * Nc if sigmoid else 0),
        bytes_accessed=(a_hat.size * 2 + grid[0] * x.size * 2 + w.size * 2
                        + b.size * 4 + N_pad * Nc * 2))

    return pl.pallas_call(
        _make_gcn_layer_kernel(sigmoid),
        out_shape=jax.ShapeDtypeStruct((N_pad, Nc), jnp.bfloat16),
        grid_spec=pltpu.PrefetchScalarGridSpec(
            num_scalar_prefetch=0,
            grid=grid,
            in_specs=[pl.BlockSpec((tm, tk), lambda i, k: (i, k)),     # A_hat tile
                      pl.BlockSpec((tk, Kdim), lambda i, k: (k, 0)),   # X slab
                      pl.BlockSpec((Kdim, Nc), lambda i, k: (0, 0)),   # W (resident)
                      pl.BlockSpec((1, Nc), lambda i, k: (0, 0))],     # bias (resident)
            out_specs=pl.BlockSpec((tm, Nc), lambda i, k: (i, 0)),
            scratch_shapes=[pltpu.VMEM((tm, Nc), jnp.float32)]),
        compiler_params=pltpu.CompilerParams(
            dimension_semantics=("parallel", "arbitrary")),
        cost_estimate=cost,
    )(a_hat, x, w, b)


# ----------------------------------------------------------------------------
# fused layer3 + layer4 + global_mean_pool (+ final Linear's multiplicative part)
#   pooled = sum_over_row_tiles  P[:, tile] @ (A_tile-row @ (X @ W3_eff) + b3_eff)
#   (W3_eff = W3*w4*wf, b3_eff = b3*w4*wf; additive b4*wf+bf added outside)
# ----------------------------------------------------------------------------
def _gcn_layer3_pool_kernel(a_ref, x_ref, w_ref, b_ref, p_ref, pooled_ref, acc_ref):
    i = pl.program_id(0)
    k = pl.program_id(1)

    @pl.when((i == 0) & (k == 0))
    def _():
        pooled_ref[...] = jnp.zeros_like(pooled_ref)

    @pl.when(k == 0)
    def _():
        acc_ref[...] = jnp.zeros_like(acc_ref)

    xw = jnp.dot(x_ref[...], w_ref[...], preferred_element_type=jnp.float32)
    acc_ref[...] += jnp.dot(a_ref[...], xw.astype(jnp.bfloat16),
                            preferred_element_type=jnp.float32)

    @pl.when(k == pl.num_programs(1) - 1)
    def _():
        h3 = (acc_ref[...] + b_ref[...]).astype(jnp.bfloat16)
        pooled_ref[...] += jnp.dot(p_ref[...], h3,
                                   preferred_element_type=jnp.float32)


def gcn_layer3_pool(a_hat, x, w, b, pool_mat, *, tm, tk):
    N_pad = a_hat.shape[0]
    Kdim = x.shape[1]
    Nc = w.shape[1]
    G_pad = pool_mat.shape[0]
    grid = (N_pad // tm, N_pad // tk)

    cost = pl.CostEstimate(
        flops=(2 * N_pad * N_pad * Nc + 2 * grid[0] * N_pad * Kdim * Nc
               + 2 * G_pad * N_pad * Nc),
        transcendentals=0,
        bytes_accessed=(a_hat.size * 2 + grid[0] * x.size * 2 + w.size * 2
                        + b.size * 4 + grid[1] * pool_mat.size * 2 + G_pad * Nc * 4))

    return pl.pallas_call(
        _gcn_layer3_pool_kernel,
        out_shape=jax.ShapeDtypeStruct((G_pad, Nc), jnp.float32),
        grid_spec=pltpu.PrefetchScalarGridSpec(
            num_scalar_prefetch=0,
            grid=grid,
            in_specs=[pl.BlockSpec((tm, tk), lambda i, k: (i, k)),      # A_hat tile
                      pl.BlockSpec((tk, Kdim), lambda i, k: (k, 0)),    # X slab
                      pl.BlockSpec((Kdim, Nc), lambda i, k: (0, 0)),    # W3_eff
                      pl.BlockSpec((1, Nc), lambda i, k: (0, 0)),       # b3_eff
                      pl.BlockSpec((G_pad, tm), lambda i, k: (0, i))],  # pool slice
            out_specs=pl.BlockSpec((G_pad, Nc), lambda i, k: (0, 0)),   # pooled (resident)
            scratch_shapes=[pltpu.VMEM((tm, Nc), jnp.float32)]),
        compiler_params=pltpu.CompilerParams(
            # pooled output accumulates across row tiles -> row axis must stay sequential.
            dimension_semantics=("arbitrary", "arbitrary")),
        cost_estimate=cost,
    )(a_hat, x, w, b, pool_mat)


# ----------------------------------------------------------------------------
# full GCN forward (3 pallas_calls)
# ----------------------------------------------------------------------------
def gcn_forward(a_hat, x, params, pool_mat):
    (w1, b1, w2, b2, w3, b3, w4, b4, wf, bf) = params
    N, F = x.shape
    Hdim = w1.shape[1]
    C = w3.shape[1]
    G = pool_mat.shape[0]
    # layer4 / final_layer are 1x1; only shape-valid when num_classes == 1.
    assert C == 1, "nn.Linear(1, 1) head requires num_classes == 1"

    N_pad = round_up(N, 128)
    F_pad = round_up(F, 128)
    H_pad = round_up(Hdim, 128)
    C_pad = round_up(C, 128)
    G_pad = round_up(G, 8)
    tm, tk = pick_tiles(N_pad)

    # Fold layer4 (w4,b4) and final_layer (wf,bf): layer3 has no activation and the
    # mean-pool matrix is row-stochastic, so
    #   ((P @ (A@(X@W3)+b3)) * w4 + b4) * wf + bf == P @ (A@(X@(W3*s)) + b3*s) + c
    # with s = w4*wf and c = b4*wf + bf.
    s = (w4.reshape(()) * wf.reshape(())).astype(jnp.float32)
    c = (b4.reshape(()) * wf.reshape(()) + bf.reshape(())).astype(jnp.float32)

    bf16 = jnp.bfloat16
    a_p = pad_to(a_hat.astype(bf16), (N_pad, N_pad))          # built once, bf16
    x_p = pad_to(x.astype(bf16), (N_pad, F_pad))
    p_p = pad_to(pool_mat.astype(bf16), (G_pad, N_pad))
    w1p = pad_to(w1.astype(bf16), (F_pad, H_pad))
    w2p = pad_to(w2.astype(bf16), (H_pad, H_pad))
    w3p = pad_to((w3 * s).astype(bf16), (H_pad, C_pad))
    b1p = pad_to(b1.reshape(1, -1).astype(jnp.float32), (1, H_pad))
    b2p = pad_to(b2.reshape(1, -1).astype(jnp.float32), (1, H_pad))
    b3p = pad_to((b3.reshape(1, -1) * s).astype(jnp.float32), (1, C_pad))

    h = gcn_layer(a_p, x_p, w1p, b1p, sigmoid=True, tm=tm, tk=tk)   # layer1 + sigmoid
    h = gcn_layer(a_p, h, w2p, b2p, sigmoid=True, tm=tm, tk=tk)     # layer2 + sigmoid
    pooled = gcn_layer3_pool(a_p, h, w3p, b3p, p_p, tm=tm, tk=tk)   # layer3+4+pool+head
    return pooled[:G, :C] + c


# ----------------------------------------------------------------------------
# pure-JAX reference mirroring the kernel's bf16/f32 dtype pipeline
# ----------------------------------------------------------------------------
def gcn_reference(a_hat, x, params, pool_mat):
    (w1, b1, w2, b2, w3, b3, w4, b4, wf, bf) = params
    bf16 = jnp.bfloat16

    def conv(a, xin, w, b):
        xw = jnp.dot(xin.astype(bf16), w.astype(bf16),
                     preferred_element_type=jnp.float32)
        return jnp.dot(a.astype(bf16), xw.astype(bf16),
                       preferred_element_type=jnp.float32) + b.reshape(1, -1)

    s = w4.reshape(()) * wf.reshape(())
    c = b4.reshape(()) * wf.reshape(()) + bf.reshape(())
    h = jax.nn.sigmoid(conv(a_hat, x, w1, b1)).astype(bf16)
    h = jax.nn.sigmoid(conv(a_hat, h, w2, b2)).astype(bf16)
    h3 = conv(a_hat, h, w3 * s, b3 * s).astype(bf16)
    pooled = jnp.dot(pool_mat.astype(bf16), h3, preferred_element_type=jnp.float32)
    return pooled + c


# ----------------------------------------------------------------------------
# graph preprocessing (index glue, plain JAX)
# ----------------------------------------------------------------------------
def build_normalized_adjacency(edge_index, edge_weight, num_nodes):
    """Dense D^{-1/2}(A + I_missing)D^{-1/2} in bf16, matching torch_geometric
    gcn_norm with add_remaining_self_loops (self-loops added only where absent)."""
    src = edge_index[0]
    dst = edge_index[1]
    if edge_weight is None:
        edge_weight = jnp.ones(src.shape[0], dtype=jnp.float32)
    a = jnp.zeros((num_nodes, num_nodes), dtype=jnp.float32)
    a = a.at[dst, src].add(edge_weight.astype(jnp.float32))        # message src -> dst
    has_loop = jnp.zeros((num_nodes,), jnp.float32).at[src].add(
        jnp.where(src == dst, 1.0, 0.0))
    a = a + jnp.diag(jnp.where(has_loop > 0, 0.0, 1.0))            # remaining self loops
    deg = jnp.sum(a, axis=1)
    dinv = jnp.where(deg > 0, jax.lax.rsqrt(deg), 0.0)
    return (dinv[:, None] * a * dinv[None, :]).astype(jnp.bfloat16)


def build_mean_pool_matrix(batch, num_graphs):
    onehot = (batch[None, :] == jnp.arange(num_graphs)[:, None]).astype(jnp.float32)
    counts = jnp.maximum(jnp.sum(onehot, axis=1, keepdims=True), 1.0)
    return (onehot / counts).astype(jnp.bfloat16)


def init_params(key, input_size, hidden_size, num_classes):
    ks = jax.random.split(key, 12)

    def lin(k, fan_in, fan_out):
        scale = 1.0 / jnp.sqrt(jnp.float32(fan_in))
        return jax.random.uniform(k, (fan_in, fan_out), jnp.float32, -scale, scale)

    w1 = lin(ks[0], input_size, hidden_size)
    b1 = jax.random.uniform(ks[1], (1, hidden_size), jnp.float32, -0.1, 0.1)
    w2 = lin(ks[2], hidden_size, hidden_size)
    b2 = jax.random.uniform(ks[3], (1, hidden_size), jnp.float32, -0.1, 0.1)
    w3 = lin(ks[4], hidden_size, num_classes)
    b3 = jax.random.uniform(ks[5], (1, num_classes), jnp.float32, -0.1, 0.1)
    w4 = lin(ks[6], num_classes, num_classes)
    b4 = jax.random.uniform(ks[7], (1, num_classes), jnp.float32, -0.1, 0.1)
    wf = lin(ks[8], 1, 1)                                          # final Linear(1, 1)
    bf = jax.random.uniform(ks[9], (1, 1), jnp.float32, -0.1, 0.1)
    return (w1, b1, w2, b2, w3, b3, w4, b4, wf, bf)


if __name__ == "__main__":
    key = jax.random.PRNGKey(0)
    k_edge, k_x, k_param = jax.random.split(key, 3)

    # Batch of 4 small ring graphs (64 nodes each) -> 256 nodes total, so the
    # row/reduction tiling (tm=128, tk=256 -> grid (2, 1)) is actually exercised.
    NODES_PER_GRAPH, NUM_GRAPHS = 64, 4
    N = NODES_PER_GRAPH * NUM_GRAPHS
    INPUT, HIDDEN, CLASSES = 16, 32, 1

    base = jnp.arange(NODES_PER_GRAPH, dtype=jnp.int32)
    offs = (jnp.arange(NUM_GRAPHS, dtype=jnp.int32) * NODES_PER_GRAPH)[:, None]
    src = (offs + base[None, :]).reshape(-1)
    dst = (offs + (base[None, :] + 1) % NODES_PER_GRAPH).reshape(-1)
    edge_index = jnp.stack([jnp.concatenate([src, dst]),
                            jnp.concatenate([dst, src])])          # [2, 2*N]
    edge_weight = jax.random.uniform(k_edge, (edge_index.shape[1],),
                                     jnp.float32, 0.5, 1.5)
    node_features = jax.random.normal(k_x, (N, INPUT), jnp.float32)
    batch = jnp.repeat(jnp.arange(NUM_GRAPHS, dtype=jnp.int32), NODES_PER_GRAPH)

    params = init_params(k_param, INPUT, HIDDEN, CLASSES)

    a_hat = build_normalized_adjacency(edge_index, edge_weight, N)
    pool_mat = build_mean_pool_matrix(batch, NUM_GRAPHS)

    fwd = jax.jit(gcn_forward)
    out = jax.block_until_ready(fwd(a_hat, node_features, params, pool_mat))
    ref = gcn_reference(a_hat, node_features, params, pool_mat)

    assert out.shape == (NUM_GRAPHS, CLASSES)
    assert bool(jnp.all(jnp.isfinite(out)))
    assert bool(jnp.allclose(out, ref, rtol=2e-2, atol=2e-2)), (out, ref)
    print("KERNEL_OK")
</pallas_src>

<mosaic_0001>
module attributes {stable_mosaic.version = 11 : i64} {
  func.func @kernel(%arg0: i32, %arg1: i32, %arg2: memref<128x256xbf16, #tpu.memory_space<vmem>>, %arg3: memref<256x128xbf16, #tpu.memory_space<vmem>>, %arg4: memref<128x128xbf16, #tpu.memory_space<vmem>>, %arg5: memref<1x128xf32, #tpu.memory_space<vmem>>, %arg6: memref<128x128xbf16, #tpu.memory_space<vmem>>, %arg7: memref<128x128xf32, #tpu.memory_space<vmem>>) attributes {dimension_semantics = [#tpu.dimension_semantics<parallel>, #tpu.dimension_semantics<arbitrary>], iteration_bounds = array<i64: 2, 1>, scalar_prefetch = 0 : i64, scratch_operands = 1 : i64, tpu.core_type = #tpu.core_type<tc>, window_params = [{transform_indices = @transform_0, window_bounds = array<i64: 128, 256>}, {transform_indices = @transform_1, window_bounds = array<i64: 256, 128>}, {pipeline_mode = #tpu.pipeline_mode<synchronous>, transform_indices = @transform_2, window_bounds = array<i64: 128, 128>}, {pipeline_mode = #tpu.pipeline_mode<synchronous>, transform_indices = @transform_3, window_bounds = array<i64: 1, 128>}, {transform_indices = @transform_4, window_bounds = array<i64: 128, 128>}]} {
    %c0_i32 = arith.constant 0 : i32
    %0 = arith.cmpi eq, %arg1, %c0_i32 : i32
    %1 = arith.extui %0 : i1 to i32
    %c0_i32_0 = arith.constant 0 : i32
    %2 = arith.cmpi ne, %1, %c0_i32_0 : i32
    scf.if %2 {
      %cst_13 = arith.constant 0.000000e+00 : f32
      %15 = vector.broadcast %cst_13 : f32 to vector<128x128xf32>
      %c0_14 = arith.constant 0 : index
      %c0_15 = arith.constant 0 : index
      %16 = vector.load %arg7[%c0_14, %c0_15] : memref<128x128xf32, #tpu.memory_space<vmem>>, vector<128x128xf32>
      tpu.vector_store %arg7[%c0_14, %c0_15], %15 {strides = array<i32>} : memref<128x128xf32, #tpu.memory_space<vmem>>, vector<128x128xf32>,
    } else {
    }
    %c0 = arith.constant 0 : index
    %c0_1 = arith.constant 0 : index
    %3 = vector.load %arg3[%c0, %c0_1] : memref<256x128xbf16, #tpu.memory_space<vmem>>, vector<256x128xbf16>
    %c0_2 = arith.constant 0 : index
    %c0_3 = arith.constant 0 : index
    %4 = vector.load %arg4[%c0_2, %c0_3] : memref<128x128xbf16, #tpu.memory_space<vmem>>, vector<128x128xbf16>
    %cst = arith.constant dense<0.000000e+00> : vector<256x128xf32>
    %5 = tpu.matmul %3, %4, %cst {dimension_numbers = #tpu.dot_dimension_numbers<[1], [0], [0], [1], [0, 0, 1, 1], [], []>} : vector<256x128xbf16>, vector<128x128xbf16>, vector<256x128xf32> -> vector<256x128xf32>
    %c0_4 = arith.constant 0 : index
    %c0_5 = arith.constant 0 : index
    %6 = vector.load %arg7[%c0_4, %c0_5] : memref<128x128xf32, #tpu.memory_space<vmem>>, vector<128x128xf32>
    %c0_6 = arith.constant 0 : index
    %c0_7 = arith.constant 0 : index
    %7 = vector.load %arg2[%c0_6, %c0_7] : memref<128x256xbf16, #tpu.memory_space<vmem>>, vector<128x256xbf16>
    %8 = arith.truncf %5 : vector<256x128xf32> to vector<256x128xbf16>
    %cst_8 = arith.constant dense<0.000000e+00> : vector<128x128xf32>
    %9 = tpu.matmul %7, %8, %cst_8 {dimension_numbers = #tpu.dot_dimension_numbers<[1], [0], [0], [1], [0, 0, 1, 1], [], []>} : vector<128x256xbf16>, vector<256x128xbf16>, vector<128x128xf32> -> vector<128x128xf32>
    %10 = arith.addf %6, %9 : vector<128x128xf32>
    %c0_9 = arith.constant 0 : index
    %c0_10 = arith.constant 0 : index
    %11 = vector.load %arg7[%c0_9, %c0_10] : memref<128x128xf32, #tpu.memory_space<vmem>>, vector<128x128xf32>
    tpu.vector_store %arg7[%c0_9, %c0_10], %10 {strides = array<i32>} : memref<128x128xf32, #tpu.memory_space<vmem>>, vector<128x128xf32>,
    %c0_i32_11 = arith.constant 0 : i32
    %12 = arith.cmpi eq, %arg1, %c0_i32_11 : i32
    %13 = arith.extui %12 : i1 to i32
    %c0_i32_12 = arith.constant 0 : i32
    %14 = arith.cmpi ne, %13, %c0_i32_12 : i32
    scf.if %14 {
      %c0_13 = arith.constant 0 : index
      %c0_14 = arith.constant 0 : index
      %15 = vector.load %arg7[%c0_13, %c0_14] : memref<128x128xf32, #tpu.memory_space<vmem>>, vector<128x128xf32>
      %c0_15 = arith.constant 0 : index
      %c0_16 = arith.constant 0 : index
      %16 = vector.load %arg5[%c0_15, %c0_16] : memref<1x128xf32, #tpu.memory_space<vmem>>, vector<1x128xf32>
      %17 = vector.broadcast %16 : vector<1x128xf32> to vector<128x128xf32>
      %18 = arith.addf %15, %17 : vector<128x128xf32>
      %19 = arith.negf %18 : vector<128x128xf32>
      %20 = math.exp %19 : vector<128x128xf32>
      %cst_17 = arith.constant 1.000000e+00 : f32
      %21 = vector.broadcast %cst_17 : f32 to vector<128x128xf32>
      %22 = arith.addf %21, %20 : vector<128x128xf32>
      %23 = arith.divf %21, %22 : vector<128x128xf32>
      %24 = arith.truncf %23 : vector<128x128xf32> to vector<128x128xbf16>
      %c0_18 = arith.constant 0 : index
      %c0_19 = arith.constant 0 : index
      %25 = vector.load %arg6[%c0_18, %c0_19] : memref<128x128xbf16, #tpu.memory_space<vmem>>, vector<128x128xbf16>
      tpu.vector_store %arg6[%c0_18, %c0_19], %24 {strides = array<i32>} : memref<128x128xbf16, #tpu.memory_space<vmem>>, vector<128x128xbf16>,
    } else {
    }
    return
  }
  func.func @transform_0(%arg0: i32, %arg1: i32) -> (i32, i32) {
    %c0_i32 = arith.constant 0 : i32
    return %arg0, %arg1 : i32, i32
  }
  func.func @transform_1(%arg0: i32, %arg1: i32) -> (i32, i32) {
    %c0_i32 = arith.constant 0 : i32
    %c0_i32_0 = arith.constant 0 : i32
    return %arg1, %c0_i32 : i32, i32
  }
  func.func @transform_2(%arg0: i32, %arg1: i32) -> (i32, i32) {
    %c0_i32 = arith.constant 0 : i32
    %c0_i32_0 = arith.constant 0 : i32
    %c0_i32_1 = arith.constant 0 : i32
    return %c0_i32, %c0_i32_0 : i32, i32
  }
  func.func @transform_3(%arg0: i32, %arg1: i32) -> (i32, i32) {
    %c0_i32 = arith.constant 0 : i32
    %c0_i32_0 = arith.constant 0 : i32
    %c0_i32_1 = arith.constant 0 : i32
    return %c0_i32, %c0_i32_0 : i32, i32
  }
  func.func @transform_4(%arg0: i32, %arg1: i32) -> (i32, i32) {
    %c0_i32 = arith.constant 0 : i32
    %c0_i32_0 = arith.constant 0 : i32
    return %arg0, %c0_i32 : i32, i32
  }
}

module attributes {stable_mosaic.version = 11 : i64} {
  func.func @_gcn_layer3_pool_kernel(%arg0: i32, %arg1: i32, %arg2: memref<128x256xbf16, #tpu.memory_space<vmem>>, %arg3: memref<256x128xbf16, #tpu.memory_space<vmem>>, %arg4: memref<128x128xbf16, #tpu.memory_space<vmem>>, %arg5: memref<1x128xf32, #tpu.memory_space<vmem>>, %arg6: memref<8x128xbf16, #tpu.memory_space<vmem>>, %arg7: memref<8x128xf32, #tpu.memory_space<vmem>>, %arg8: memref<128x128xf32, #tpu.memory_space<vmem>>) attributes {dimension_semantics = [#tpu.dimension_semantics<arbitrary>, #tpu.dimension_semantics<arbitrary>], iteration_bounds = array<i64: 2, 1>, scalar_prefetch = 0 : i64, scratch_operands = 1 : i64, tpu.core_type = #tpu.core_type<tc>, window_params = [{transform_indices = @transform_0, window_bounds = array<i64: 128, 256>}, {transform_indices = @transform_1, window_bounds = array<i64: 256, 128>}, {pipeline_mode = #tpu.pipeline_mode<synchronous>, transform_indices = @transform_2, window_bounds = array<i64: 128, 128>}, {pipeline_mode = #tpu.pipeline_mode<synchronous>, transform_indices = @transform_3, window_bounds = array<i64: 1, 128>}, {transform_indices = @transform_4, window_bounds = array<i64: 8, 128>}, {pipeline_mode = #tpu.pipeline_mode<synchronous>, transform_indices = @transform_5, window_bounds = array<i64: 8, 128>}]} {
    %c0_i32 = arith.constant 0 : i32
    %0 = arith.cmpi eq, %arg0, %c0_i32 : i32
    %c0_i32_0 = arith.constant 0 : i32
    %1 = arith.cmpi eq, %arg1, %c0_i32_0 : i32
    %2 = arith.andi %0, %1 : i1
    %3 = arith.extui %2 : i1 to i32
    %c0_i32_1 = arith.constant 0 : i32
    %4 = arith.cmpi ne, %3, %c0_i32_1 : i32
    scf.if %4 {
      %cst_16 = arith.constant 0.000000e+00 : f32
      %20 = vector.broadcast %cst_16 : f32 to vector<8x128xf32>
      %c0_17 = arith.constant 0 : index
      %c0_18 = arith.constant 0 : index
      %21 = vector.load %arg7[%c0_17, %c0_18] : memref<8x128xf32, #tpu.memory_space<vmem>>, vector<8x128xf32>
      tpu.vector_store %arg7[%c0_17, %c0_18], %20 {strides = array<i32>} : memref<8x128xf32, #tpu.memory_space<vmem>>, vector<8x128xf32>,
    } else {
    }
    %c0_i32_2 = arith.constant 0 : i32
    %5 = arith.cmpi eq, %arg1, %c0_i32_2 : i32
    %6 = arith.extui %5 : i1 to i32
    %c0_i32_3 = arith.constant 0 : i32
    %7 = arith.cmpi ne, %6, %c0_i32_3 : i32
    scf.if %7 {
      %cst_16 = arith.constant 0.000000e+00 : f32
      %20 = vector.broadcast %cst_16 : f32 to vector<128x128xf32>
      %c0_17 = arith.constant 0 : index
      %c0_18 = arith.constant 0 : index
      %21 = vector.load %arg8[%c0_17, %c0_18] : memref<128x128xf32, #tpu.memory_space<vmem>>, vector<128x128xf32>
      tpu.vector_store %arg8[%c0_17, %c0_18], %20 {strides = array<i32>} : memref<128x128xf32, #tpu.memory_space<vmem>>, vector<128x128xf32>,
    } else {
    }
    %c0 = arith.constant 0 : index
    %c0_4 = arith.constant 0 : index
    %8 = vector.load %arg3[%c0, %c0_4] : memref<256x128xbf16, #tpu.memory_space<vmem>>, vector<256x128xbf16>
    %c0_5 = arith.constant 0 : index
    %c0_6 = arith.constant 0 : index
    %9 = vector.load %arg4[%c0_5, %c0_6] : memref<128x128xbf16, #tpu.memory_space<vmem>>, vector<128x128xbf16>
    %cst = arith.constant dense<0.000000e+00> : vector<256x128xf32>
    %10 = tpu.matmul %8, %9, %cst {dimension_numbers = #tpu.dot_dimension_numbers<[1], [0], [0], [1], [0, 0, 1, 1], [], []>} : vector<256x128xbf16>, vector<128x128xbf16>, vector<256x128xf32> -> vector<256x128xf32>
    %c0_7 = arith.constant 0 : index
    %c0_8 = arith.constant 0 : index
    %11 = vector.load %arg8[%c0_7, %c0_8] : memref<128x128xf32, #tpu.memory_space<vmem>>, vector<128x128xf32>
    %c0_9 = arith.constant 0 : index
    %c0_10 = arith.constant 0 : index
    %12 = vector.load %arg2[%c0_9, %c0_10] : memref<128x256xbf16, #tpu.memory_space<vmem>>, vector<128x256xbf16>
    %13 = arith.truncf %10 : vector<256x128xf32> to vector<256x128xbf16>
    %cst_11 = arith.constant dense<0.000000e+00> : vector<128x128xf32>
    %14 = tpu.matmul %12, %13, %cst_11 {dimension_numbers = #tpu.dot_dimension_numbers<[1], [0], [0], [1], [0, 0, 1, 1], [], []>} : vector<128x256xbf16>, vector<256x128xbf16>, vector<128x128xf32> -> vector<128x128xf32>
    %15 = arith.addf %11, %14 : vector<128x128xf32>
    %c0_12 = arith.constant 0 : index
    %c0_13 = arith.constant 0 : index
    %16 = vector.load %arg8[%c0_12, %c0_13] : memref<128x128xf32, #tpu.memory_space<vmem>>, vector<128x128xf32>
    tpu.vector_store %arg8[%c0_12, %c0_13], %15 {strides = array<i32>} : memref<128x128xf32, #tpu.memory_space<vmem>>, vector<128x128xf32>,
    %c0_i32_14 = arith.constant 0 : i32
    %17 = arith.cmpi eq, %arg1, %c0_i32_14 : i32
    %18 = arith.extui %17 : i1 to i32
    %c0_i32_15 = arith.constant 0 : i32
    %19 = arith.cmpi ne, %18, %c0_i32_15 : i32
    scf.if %19 {
      %c0_16 = arith.constant 0 : index
      %c0_17 = arith.constant 0 : index
      %20 = vector.load %arg8[%c0_16, %c0_17] : memref<128x128xf32, #tpu.memory_space<vmem>>, vector<128x128xf32>
      %c0_18 = arith.constant 0 : index
      %c0_19 = arith.constant 0 : index
      %21 = vector.load %arg5[%c0_18, %c0_19] : memref<1x128xf32, #tpu.memory_space<vmem>>, vector<1x128xf32>
      %22 = vector.broadcast %21 : vector<1x128xf32> to vector<128x128xf32>
      %23 = arith.addf %20, %22 : vector<128x128xf32>
      %24 = arith.truncf %23 : vector<128x128xf32> to vector<128x128xbf16>
      %c0_20 = arith.constant 0 : index
      %c0_21 = arith.constant 0 : index
      %25 = vector.load %arg7[%c0_20, %c0_21] : memref<8x128xf32, #tpu.memory_space<vmem>>, vector<8x128xf32>
      %c0_22 = arith.constant 0 : index
      %c0_23 = arith.constant 0 : index
      %26 = vector.load %arg6[%c0_22, %c0_23] : memref<8x128xbf16, #tpu.memory_space<vmem>>, vector<8x128xbf16>
      %cst_24 = arith.constant dense<0.000000e+00> : vector<8x128xf32>
      %27 = tpu.matmul %26, %24, %cst_24 {dimension_numbers = #tpu.dot_dimension_numbers<[1], [0], [0], [1], [0, 0, 1, 1], [], []>} : vector<8x128xbf16>, vector<128x128xbf16>, vector<8x128xf32> -> vector<8x128xf32>
      %28 = arith.addf %25, %27 : vector<8x128xf32>
      %c0_25 = arith.constant 0 : index
      %c0_26 = arith.constant 0 : index
      %29 = vector.load %arg7[%c0_25, %c0_26] : memref<8x128xf32, #tpu.memory_space<vmem>>, vector<8x128xf32>
      tpu.vector_store %arg7[%c0_25, %c0_26], %28 {strides = array<i32>} : memref<8x128xf32, #tpu.memory_space<vmem>>, vector<8x128xf32>,
    } else {
    }
    return
  }
  func.func @transform_0(%arg0: i32, %arg1: i32) -> (i32, i32) {
    %c0_i32 = arith.constant 0 : i32
    return %arg0, %arg1 : i32, i32
  }
  func.func @transform_1(%arg0: i32, %arg1: i32) -> (i32, i32) {
    %c0_i32 = arith.constant 0 : i32
    %c0_i32_0 = arith.constant 0 : i32
    return %arg1, %c0_i32 : i32, i32
  }
  func.func @transform_2(%arg0: i32, %arg1: i32) -> (i32, i32) {
    %c0_i32 = arith.constant 0 : i32
    %c0_i32_0 = arith.constant 0 : i32
    %c0_i32_1 = arith.constant 0 : i32
    return %c0_i32, %c0_i32_0 : i32, i32
  }
  func.func @transform_3(%arg0: i32, %arg1: i32) -> (i32, i32) {
    %c0_i32 = arith.constant 0 : i32
    %c0_i32_0 = arith.constant 0 : i32
    %c0_i32_1 = arith.constant 0 : i32
    return %c0_i32, %c0_i32_0 : i32, i32
  }
  func.func @transform_4(%arg0: i32, %arg1: i32) -> (i32, i32) {
    %c0_i32 = arith.constant 0 : i32
    %c0_i32_0 = arith.constant 0 : i32
    return %c0_i32, %arg0 : i32, i32
  }
  func.func @transform_5(%arg0: i32, %arg1: i32) -> (i32, i32) {
    %c0_i32 = arith.constant 0 : i32
    %c0_i32_0 = arith.constant 0 : i32
    %c0_i32_1 = arith.constant 0 : i32
    return %c0_i32, %c0_i32_0 : i32, i32
  }
}

</mosaic_0001>

<bundles_post_ra>
// kernel: gcn_forward.5
= control target key start
LH: loop header
LB: loop body
LE: loop exit
PB: predicated region body
PF: predicated region fallthrough
CT: control target
= control target key end

     0   :  { %s1284_s18 = smov 0   ;;  %s1286_s19 = smov 0   ;;  %s1477_s0 = inlined_call_operand.vmem [shape: bf16[256,256], index: 0, kind: input, shape index: {}]   ;;  %s1478_s1 = inlined_call_operand.vmem [shape: bf16[256,128], index: 1, kind: input, shape index: {}]   ;;  %s1479_s2 = inlined_call_operand.vmem [shape: bf16[128,128], index: 2, kind: input, shape index: {}]   ;;  %s1480_s3 = inlined_call_operand.vmem [shape: f32[1,128], index: 3, kind: input, shape index: {}]   ;;  %s1481_s4 = inlined_call_operand.vmem [shape: bf16[8,256], index: 4, kind: input, shape index: {}]   ;;  %s1482_s5 = inlined_call_operand.vmem [shape: f32[8,128], index: 5, kind: output, shape index: {}]  }
   0x1   :  { %s1288_s20 = smov 0  }
   0x2 LB: > { %s27_s21 = sadd.s32 1, %s1247_s19  ;;  %p985_p0 = scmp.ge.s32.totalorder %s1251_s20, 1  ;;  %s1251_s20 = sphi %s1288_s20, %s15_s20   ;;  %s1247_s19 = sphi %s1286_s19, %s1484_s19   ;;  %s1243_s18 = sphi %s1284_s18, %s1483_s18  }
   0x3   : > { %p29_p1 = scmp.ge.s32.totalorder %s27_s21, 2  ;;  %p223_p2 = scmp.lt.s32.totalorder %s1251_s20, 3 }
   0x5   : > { %s1486_s21 = smov (%p29_p1, %s27_s21), 0  ;;  %p224_p3 = pnand %p985_p0, %p223_p2 }
   0x6   : > { %s986_s22 = sshll.u32 (!%p224_p3), %s1243_s18, 4  ;;  %p278_p4 = scmp.lt.s32.totalorder (!%p224_p3), %s1243_s18, 1 }
   0x7   : > { %227 = sbr.rel (%p224_p3) target bundleno = 754 (0x2f2), region = 40  ;;  %p262_p5 = scmp.lt.s32.totalorder (!%p224_p3), %s986_s22, 31 }
   0x8   : > { %p282_p6 = scmp.eq.s32.totalorder (!%p224_p3), %s1243_s18, 0 }
   0xc   : > { %s1488_s18 = smov (!%p278_p4, %s1243_s18), 1  ;;  %s1490_s22 = smov (!%p262_p5, %s986_s22), 31  ;;  %v1253_v0 = vmov (%p282_p6), 0.0  }
   0xd   : > { %s989_s23 = sshll.u32 %s1488_s18, 2  ;;  %s1153_s24 = sshll.u32 %s1490_s22, 3  ;;  %288 = vst [vmem:[%s1482_s5] sm:$0xff] (%p282_p6), %v1253_v0 }
   0xe   : > { %s1305_s27 = scalar_lea.vmem %s1481_s4, %s989_s23  ;;  %s1310_s30 = scalar_lea.vmem %s1477_s0, %s1153_s24 }
   0xf   : > { %287 = sbr.rel (!%p282_p6) target bundleno = 20 (0x14), region = 44 }
  0x14 PF: > { %v1178_v1 = vld [vmem:[%s1479_s2 + $0x38] sm:$0xff]  ;;  %v1177_v2 = vld [vmem:[%s1479_s2 + $0x30] sm:$0xff]  ;;  %v1176_v3 = vld [vmem:[%s1479_s2 + $0x28] sm:$0xff] }
  0x15   : > { %500 = vmatpush.bf16.msra.mxu0 %v1178_v1  ;;  %1195 = vmatpush.bf16.msra.mxu3 %v1178_v1  ;;  %v1175_v4 = vld [vmem:[%s1479_s2 + $0x20] sm:$0xff]  ;;  %v1174_v5 = vld [vmem:[%s1479_s2 + $0x18] sm:$0xff]  ;;  %v1173_v6 = vld [vmem:[%s1479_s2 + $0x10] sm:$0xff] }
  0x16   : > { %v1172_v7 = vld [vmem:[%s1479_s2 + $0x8] sm:$0xff]  ;;  %v1171_v8 = vld [vmem:[%s1479_s2] sm:$0xff]  ;;  %v1165_v12 = vld [vmem:[%s1478_s1 + $0x50] sm:$0xff] }
  0x17   : > { %v1155_v9 = vld [vmem:[%s1478_s1] sm:$0xff]  ;;  %v1164_v10 = vld [vmem:[%s1478_s1 + $0x48] sm:$0xff]  ;;  %v1157_v13 = vld [vmem:[%s1478_s1 + $0x10] sm:$0xff] }
  0x18   : > { %v1156_v11 = vld [vmem:[%s1478_s1 + $0x8] sm:$0xff]  ;;  %v1166_v14 = vld [vmem:[%s1478_s1 + $0x58] sm:$0xff]  ;;  %v1167_v16 = vld [vmem:[%s1478_s1 + $0x60] sm:$0xff] }
  0x19   : > { %501 = vmatpush.bf16.msra.mxu0 %v1177_v2  ;;  %1196 = vmatpush.bf16.msra.mxu3 %v1177_v2  ;;  %v1158_v15 = vld [vmem:[%s1478_s1 + $0x18] sm:$0xff]  ;;  %v1159_v17 = vld [vmem:[%s1478_s1 + $0x20] sm:$0xff]  ;;  %v1168_v18 = vld [vmem:[%s1478_s1 + $0x68] sm:$0xff] }
  0x1a   : > { %v1160_v19 = vld [vmem:[%s1478_s1 + $0x28] sm:$0xff]  ;;  %v1169_v20 = vld [vmem:[%s1478_s1 + $0x70] sm:$0xff]  ;;  %v1170_v22 = vld [vmem:[%s1478_s1 + $0x78] sm:$0xff] }
  0x1b   : > { %v1161_v21 = vld [vmem:[%s1478_s1 + $0x30] sm:$0xff]  ;;  %v1162_v23 = vld [vmem:[%s1478_s1 + $0x38] sm:$0xff]  ;;  %v1163_v24 = vld [vmem:[%s1478_s1 + $0x40] sm:$0xff] }
  0x1d   : > { %502 = vmatpush.bf16.msra.mxu0 %v1176_v3  ;;  %1197 = vmatpush.bf16.msra.mxu3 %v1176_v3 }
  0x21   : > { %503 = vmatpush.bf16.msra.mxu0 %v1175_v4  ;;  %1198 = vmatpush.bf16.msra.mxu3 %v1175_v4 }
  0x25   : > { %504 = vmatpush.bf16.msra.mxu0 %v1174_v5  ;;  %1199 = vmatpush.bf16.msra.mxu3 %v1174_v5 }
  0x29   : > { %505 = vmatpush.bf16.msra.mxu0 %v1173_v6  ;;  %1200 = vmatpush.bf16.msra.mxu3 %v1173_v6 }
  0x2d   : > { %506 = vmatpush.bf16.msra.mxu0 %v1172_v7  ;;  %1201 = vmatpush.bf16.msra.mxu3 %v1172_v7 }
  0x31   : > { %507 = vmatpush.bf16.msra.mxu0 %v1171_v8  ;;  %1202 = vmatpush.bf16.msra.mxu3 %v1171_v8  ;;  %v1179_v8 = vld [vmem:[%s1310_s30 + $0x4] sm:$0xf] }
  0x34   : > { %508 = vmatmul.bf16.vlgmr.msra.gmra.mxu0 %v1155_v9  ;;  %553 = vmatmul.bf16.vlgmr.msra.gmra.mxu3 %v1164_v10  ;;  %v1091_v9 = vld [vmem:[%s1310_s30 + $0x8] sm:$0xf0] }
  0x44   : > { %513 = vmatmul.bf16.gmra.mxu0 %v1156_v11  ;;  %558 = vmatmul.bf16.gmra.mxu3 %v1165_v12  ;;  %v1094_v11 = vor.u32 %v1179_v8, %v1091_v9  ;;  %v1089_v12 = vld [vmem:[%s1310_s30] sm:$0xf] }
  0x54   : > { %518 = vmatmul.bf16.gmra.mxu0 %v1157_v13  ;;  %563 = vmatmul.bf16.gmra.mxu3 %v1166_v14  ;;  %v1180_v13 = vld [vmem:[%s1310_s30 + $0x4] sm:$0xf0] }
  0x55   : > { %v1090_v14 = vor.u32 %v1180_v13, %v1089_v12 }
  0x64   : > { %523 = vmatmul.bf16.gmra.mxu0 %v1158_v15  ;;  %568 = vmatmul.bf16.gmra.mxu3 %v1167_v16  ;;  %v1181_v15 = vld [vmem:[%s1310_s30 + $0x14] sm:$0xf]  ;;  %v1099_v16 = vld [vmem:[%s1310_s30 + $0x18] sm:$0xf0] }
  0x74   : > { %528 = vmatmul.bf16.gmra.mxu0 %v1159_v17  ;;  %573 = vmatmul.bf16.gmra.mxu3 %v1168_v18  ;;  %v1102_v17 = vor.u32 %v1181_v15, %v1099_v16  ;;  %v1097_v18 = vld [vmem:[%s1310_s30 + $0x10] sm:$0xf] }
  0x84   : > { %533 = vmatmul.bf16.gmra.mxu0 %v1160_v19  ;;  %578 = vmatmul.bf16.gmra.mxu3 %v1169_v20  ;;  %v1182_v19 = vld [vmem:[%s1310_s30 + $0x14] sm:$0xf0] }
  0x85   : > { %v1098_v20 = vor.u32 %v1182_v19, %v1097_v18 }
  0x94   : > { %538 = vmatmul.bf16.gmra.mxu0 %v1161_v21  ;;  %583 = vmatmul.bf16.gmra.mxu3 %v1170_v22  ;;  %v1183_v21 = vld [vmem:[%s1310_s30 + $0x24] sm:$0xf]  ;;  %v1107_v22 = vld [vmem:[%s1310_s30 + $0x28] sm:$0xf0] }
  0xa4   : > { %543 = vmatmul.bf16.gmra.mxu0 %v1162_v23  ;;  %v1110_v23 = vor.u32 %v1183_v21, %v1107_v22 }
  0xb1   : > { %v1387_v25 = vpop.f32.mrf.mxu0 }
  0xb4   : > { %548 = vmatmul.bf16.gmra.mxu0 %v1163_v24  ;;  %v1105_v24 = vld [vmem:[%s1310_s30 + $0x20] sm:$0xf] }
  0xb7   : > { %v554_v26 = vpop.f32.mrf.mxu3 }
  0xb9   : > { %v1389_v27 = vpop.f32.mrf.mxu0 }
  0xba   : > { %v621_v28 = vpack.c.bf16 %v1389_v27, %v1387_v25  ;;  %v1184_v25 = vld [vmem:[%s1310_s30 + $0x24] sm:$0xf0]  ;;  %v1185_v27 = vld [vmem:[%s1310_s30 + $0x34] sm:$0xf] }
  0xbf   : > { %v556_v29 = vpop.f32.mrf.mxu3 }
  0xc0   : > { %v630_v30 = vpack.c.bf16 %v556_v29, %v554_v26  ;;  %v1106_v26 = vor.u32 %v1184_v25, %v1105_v24 }
  0xc1   : > { %v514_v31 = vpop.f32.mrf.mxu0 }
  0xc7   : > { %v559_v32 = vpop.f32.mrf.mxu3 }
  0xc9   : > { %v516_v33 = vpop.f32.mrf.mxu0 }
  0xca   : > { %v622_v34 = vpack.c.bf16 %v516_v33, %v514_v31  ;;  %v1186_v31 = vld [vmem:[%s1310_s30 + $0x34] sm:$0xf0]  ;;  %v1187_v33 = vld [vmem:[%s1310_s30 + $0x44] sm:$0xf] }
  0xcf   : > { %v561_v35 = vpop.f32.mrf.mxu3 }
  0xd0   : > { %v631_v36 = vpack.c.bf16 %v561_v35, %v559_v32 }
  0xd1   : > { %v519_v37 = vpop.f32.mrf.mxu0 }
  0xd7   : > { %v564_v38 = vpop.f32.mrf.mxu3 }
  0xd9   : > { %v521_v39 = vpop.f32.mrf.mxu0 }
  0xda   : > { %v623_v40 = vpack.c.bf16 %v521_v39, %v519_v37  ;;  %v1188_v37 = vld [vmem:[%s1310_s30 + $0x44] sm:$0xf0]  ;;  %v1189_v39 = vld [vmem:[%s1310_s30 + $0x54] sm:$0xf] }
  0xdf   : > { %v566_v41 = vpop.f32.mrf.mxu3 }
  0xe0   : > { %v632_v42 = vpack.c.bf16 %v566_v41, %v564_v38 }
  0xe1   : > { %v524_v43 = vpop.f32.mrf.mxu0 }
  0xe7   : > { %v569_v44 = vpop.f32.mrf.mxu3 }
  0xe9   : > { %v526_v45 = vpop.f32.mrf.mxu0 }
  0xea   : > { %v624_v46 = vpack.c.bf16 %v526_v45, %v524_v43  ;;  %v1190_v43 = vld [vmem:[%s1310_s30 + $0x54] sm:$0xf0]  ;;  %v1191_v45 = vld [vmem:[%s1310_s30 + $0x64] sm:$0xf] }
  0xef   : > { %v571_v47 = vpop.f32.mrf.mxu3 }
  0xf0   : > { %v633_v2 = vpack.c.bf16 %v571_v47, %v569_v44 }
  0xf1   : > { %v529_v48 = vpop.f32.mrf.mxu0 }
  0xf7   : > { %v574_v49 = vpop.f32.mrf.mxu3 }
  0xf9   : > { %v531_v50 = vpop.f32.mrf.mxu0 }
  0xfa   : > { %v625_v6 = vpack.c.bf16 %v531_v50, %v529_v48  ;;  %v1137_v48 = vld [vmem:[%s1310_s30 + $0x60] sm:$0xf] }
  0xff   : > { %v576_v51 = vpop.f32.mrf.mxu3 }
 0x100   : > { %v634_v63 = vpack.c.bf16 %v576_v51, %v574_v49  ;;  %v1192_v49 = vld [vmem:[%s1310_s30 + $0x64] sm:$0xf0]  ;;  %v1193_v51 = vld [vmem:[%s1310_s30 + $0x74] sm:$0xf] }
 0x101   : > { %v534_v52 = vpop.f32.mrf.mxu0  ;;  %v1138_v50 = vor.u32 %v1192_v49, %v1137_v48 }
 0x107   : > { %v579_v53 = vpop.f32.mrf.mxu3 }
 0x109   : > { %v536_v54 = vpop.f32.mrf.mxu0 }
 0x10a   : > { %v626_v5 = vpack.c.bf16 %v536_v54, %v534_v52  ;;  %v1147_v52 = vld [vmem:[%s1310_s30 + $0x78] sm:$0xf0]  ;;  %v1145_v54 = vld [vmem:[%s1310_s30 + $0x70] sm:$0xf] }
 0x10f   : > { %v581_v55 = vpop.f32.mrf.mxu3 }
 0x110   : > { %v635_v62 = vpack.c.bf16 %v581_v55, %v579_v53  ;;  %v1150_v53 = vor.u32 %v1193_v51, %v1147_v52  ;;  %v1194_v55 = vld [vmem:[%s1310_s30 + $0x74] sm:$0xf0] }
 0x111   : > { %v539_v56 = vpop.f32.mrf.mxu0 }
 0x117   : > { %v584_v57 = vpop.f32.mrf.mxu3 }
 0x119   : > { %v541_v58 = vpop.f32.mrf.mxu0 }
 0x11a   : > { %v627_v3 = vpack.c.bf16 %v541_v58, %v539_v56  ;;  %v1146_v56 = vor.u32 %v1194_v55, %v1145_v54 }
 0x11f   : > { %v586_v59 = vpop.f32.mrf.mxu3 }
 0x120   : > { %v636_v60 = vpack.c.bf16 %v586_v59, %v584_v57 }
 0x121   : > { %v544_v61 = vpop.f32.mrf.mxu0 }
 0x122   : > { %766 = vmatpush.bf16.msra.mxu2 %v636_v60 }
 0x126   : > { %767 = vmatpush.bf16.msra.mxu2 %v635_v62 }
 0x129   : > { %v546_v0 = vpop.f32.mrf.mxu0 }
 0x12a   : > { %768 = vmatpush.bf16.msra.mxu2 %v634_v63  ;;  %v628_v1 = vpack.c.bf16 %v546_v0, %v544_v61  ;;  %v1431_v61 = vld [vmem:[%s1480_s3] ss:$0 sm:$0xff] }
 0x12c   : > { %717 = vmatpush.bf16.msra.mxu1 %v628_v1 }
 0x12e   : > { %769 = vmatpush.bf16.msra.mxu2 %v633_v2 }
 0x130   : > { %718 = vmatpush.bf16.msra.mxu1 %v627_v3 }
 0x131   : > { %v549_v4 = vpop.f32.mrf.mxu0 }
 0x132   : > { %770 = vmatpush.bf16.msra.mxu2 %v632_v42  ;;  %v1129_v42 = vld [vmem:[%s1310_s30 + $0x50] sm:$0xf] }
 0x133   : > { %v1130_v44 = vor.u32 %v1190_v43, %v1129_v42 }
 0x134   : > { %719 = vmatpush.bf16.msra.mxu1 %v626_v5 }
 0x136   : > { %771 = vmatpush.bf16.msra.mxu2 %v631_v36  ;;  %v1121_v36 = vld [vmem:[%s1310_s30 + $0x40] sm:$0xf] }
 0x137   : > { %v1122_v38 = vor.u32 %v1188_v37, %v1121_v36 }
 0x138   : > { %720 = vmatpush.bf16.msra.mxu1 %v625_v6 }
 0x139   : > { %v551_v7 = vpop.f32.mrf.mxu0 }
 0x13a   : > { %772 = vmatpush.bf16.msra.mxu2 %v630_v30  ;;  %v629_v10 = vpack.c.bf16 %v551_v7, %v549_v4  ;;  %v1113_v30 = vld [vmem:[%s1310_s30 + $0x30] sm:$0xf] }
 0x13b   : > { %v1114_v32 = vor.u32 %v1186_v31, %v1113_v30 }
 0x13c   : > { %721 = vmatpush.bf16.msra.mxu1 %v624_v46  ;;  %v1139_v46 = vld [vmem:[%s1310_s30 + $0x68] sm:$0xf0] }
 0x13d   : > { %v1142_v47 = vor.u32 %v1191_v45, %v1139_v46 }
 0x13e   : > { %773 = vmatpush.bf16.msra.mxu2 %v629_v10 }
 0x140   : > { %722 = vmatpush.bf16.msra.mxu1 %v623_v40  ;;  %v1131_v40 = vld [vmem:[%s1310_s30 + $0x58] sm:$0xf0] }
 0x141   : > { %774 = vmatmul.bf16.vlgmr.msra.gmra.mxu2 %v1094_v11  ;;  %v1134_v41 = vor.u32 %v1189_v39, %v1131_v40 }
 0x144   : > { %723 = vmatpush.bf16.msra.mxu1 %v622_v34  ;;  %v1123_v34 = vld [vmem:[%s1310_s30 + $0x48] sm:$0xf0] }
 0x145   : > { %v1126_v35 = vor.u32 %v1187_v33, %v1123_v34 }
 0x148   : > { %724 = vmatpush.bf16.msra.mxu1 %v621_v28  ;;  %v1115_v28 = vld [vmem:[%s1310_s30 + $0x38] sm:$0xf0] }
 0x149   : > { %v1118_v29 = vor.u32 %v1185_v27, %v1115_v28 }
 0x14b   : > { %725 = vmatmul.bf16.vlgmr.msra.gmra.mxu1 %v1090_v14 }
 0x151   : > { %779 = vmatmul.bf16.gmra.mxu2 %v1102_v17 }
 0x15b   : > { %730 = vmatmul.bf16.gmra.mxu1 %v1098_v20 }
 0x161   : > { %784 = vmatmul.bf16.gmra.mxu2 %v1110_v23 }
 0x16b   : > { %735 = vmatmul.bf16.gmra.mxu1 %v1106_v26 }
 0x171   : > { %789 = vmatmul.bf16.gmra.mxu2 %v1118_v29 }
 0x17b   : > { %740 = vmatmul.bf16.gmra.mxu1 %v1114_v32 }
 0x181   : > { %794 = vmatmul.bf16.gmra.mxu2 %v1126_v35 }
 0x18b   : > { %745 = vmatmul.bf16.gmra.mxu1 %v1122_v38 }
 0x191   : > { %799 = vmatmul.bf16.gmra.mxu2 %v1134_v41 }
 0x19b   : > { %750 = vmatmul.bf16.gmra.mxu1 %v1130_v44 }
 0x1a1   : > { %804 = vmatmul.bf16.gmra.mxu2 %v1142_v47 }
 0x1ab   : > { %755 = vmatmul.bf16.gmra.mxu1 %v1138_v50 }
 0x1b1   : > { %809 = vmatmul.bf16.gmra.mxu2 %v1150_v53 }
 0x1bb   : > { %760 = vmatmul.bf16.gmra.mxu1 %v1146_v56 }
 0x1c4   : > { %v775_v57 = vpop.f32.mrf.mxu2 }
 0x1c8   : > { %v726_v58 = vpop.f32.mrf.mxu1 }
 0x1c9   : > { %v776_v59 = vadd.f32 %v775_v57, %v726_v58 }
 0x1cb   : > { %v1434_v0 = vadd.f32 %v1431_v61, %v776_v59 }
 0x1cc   : > { %v777_v60 = vpop.f32.mrf.mxu2 }
 0x1d0   : > { %v728_v62 = vpop.f32.mrf.mxu1 }
 0x1d1   : > { %v778_v63 = vadd.f32 %v777_v60, %v728_v62 }
 0x1d3   : > { %v1437_v1 = vadd.f32 %v1431_v61, %v778_v63 }
 0x1d4   : > { %v780_v2 = vpop.f32.mrf.mxu2 }
 0x1d5   : > { %v886_v3 = vpack.c.bf16 %v1437_v1, %v1434_v0 }
 0x1d8   : > { %v731_v4 = vpop.f32.mrf.mxu1 }
 0x1d9   : > { %v781_v5 = vadd.f32 %v780_v2, %v731_v4 }
 0x1db   : > { %v1442_v9 = vadd.f32 %v1431_v61, %v781_v5 }
 0x1dc   : > { %v782_v6 = vpop.f32.mrf.mxu2 }
 0x1e0   : > { %v733_v7 = vpop.f32.mrf.mxu1 }
 0x1e1   : > { %v783_v8 = vadd.f32 %v782_v6, %v733_v7  ;;  %v895_v6 = vld [vmem:[%s1305_s27] sm:$0xf] }
 0x1e2   : > { %v894_v7 = vld [vmem:[%s1482_s5] sm:$0xff] }
 0x1e3   : > { %v873_v10 = vadd.f32 %v1431_v61, %v783_v8 }
 0x1e4   : > { %v785_v11 = vpop.f32.mrf.mxu2 }
 0x1e5   : > { %v887_v12 = vpack.c.bf16 %v873_v10, %v1442_v9 }
 0x1e8   : > { %v736_v13 = vpop.f32.mrf.mxu1 }
 0x1e9   : > { %v786_v14 = vadd.f32 %v785_v11, %v736_v13 }
 0x1eb   : > { %v874_v18 = vadd.f32 %v1431_v61, %v786_v14 }
 0x1ec   : > { %v787_v15 = vpop.f32.mrf.mxu2 }
 0x1f0   : > { %v738_v16 = vpop.f32.mrf.mxu1 }
 0x1f1   : > { %v788_v17 = vadd.f32 %v787_v15, %v738_v16 }
 0x1f3   : > { %v875_v19 = vadd.f32 %v1431_v61, %v788_v17 }
 0x1f4   : > { %v790_v20 = vpop.f32.mrf.mxu2 }
 0x1f5   : > { %v888_v21 = vpack.c.bf16 %v875_v19, %v874_v18 }
 0x1f8   : > { %v741_v22 = vpop.f32.mrf.mxu1 }
 0x1f9   : > { %v791_v23 = vadd.f32 %v790_v20, %v741_v22 }
 0x1fb   : > { %v876_v27 = vadd.f32 %v1431_v61, %v791_v23 }
 0x1fc   : > { %v792_v24 = vpop.f32.mrf.mxu2 }
 0x200   : > { %v743_v25 = vpop.f32.mrf.mxu1 }
 0x201   : > { %v793_v26 = vadd.f32 %v792_v24, %v743_v25 }
 0x203   : > { %v877_v28 = vadd.f32 %v1431_v61, %v793_v26 }
 0x204   : > { %v795_v29 = vpop.f32.mrf.mxu2 }
 0x205   : > { %v889_v30 = vpack.c.bf16 %v877_v28, %v876_v27 }
 0x208   : > { %v746_v31 = vpop.f32.mrf.mxu1 }
 0x209   : > { %v796_v32 = vadd.f32 %v795_v29, %v746_v31 }
 0x20b   : > { %v878_v4 = vadd.f32 %v1431_v61, %v796_v32 }
 0x20c   : > { %v797_v33 = vpop.f32.mrf.mxu2 }
 0x210   : > { %v748_v34 = vpop.f32.mrf.mxu1 }
 0x211   : > { %v798_v58 = vadd.f32 %v797_v33, %v748_v34 }
 0x213   : > { %v879_v63 = vadd.f32 %v1431_v61, %v798_v58 }
 0x214   : > { %v800_v35 = vpop.f32.mrf.mxu2 }
 0x215   : > { %v890_v5 = vpack.c.bf16 %v879_v63, %v878_v4 }
 0x218   : > { %v751_v36 = vpop.f32.mrf.mxu1 }
 0x219   : > { %v801_v56 = vadd.f32 %v800_v35, %v751_v36 }
 0x21b   : > { %v880_v62 = vadd.f32 %v1431_v61, %v801_v56 }
 0x21c   : > { %v802_v37 = vpop.f32.mrf.mxu2 }
 0x220   : > { %v753_v38 = vpop.f32.mrf.mxu1 }
 0x221   : > { %v803_v53 = vadd.f32 %v802_v37, %v753_v38 }
 0x223   : > { %v881_v59 = vadd.f32 %v1431_v61, %v803_v53 }
 0x224   : > { %v805_v39 = vpop.f32.mrf.mxu2 }
 0x225   : > { %v891_v2 = vpack.c.bf16 %v881_v59, %v880_v62 }
 0x228   : > { %v756_v40 = vpop.f32.mrf.mxu1 }
 0x229   : > { %v806_v50 = vadd.f32 %v805_v39, %v756_v40 }
 0x22b   : > { %v882_v57 = vadd.f32 %v1431_v61, %v806_v50 }
 0x22c   : > { %v807_v41 = vpop.f32.mrf.mxu2 }
 0x230   : > { %v758_v42 = vpop.f32.mrf.mxu1 }
 0x231   : > { %v808_v48 = vadd.f32 %v807_v41, %v758_v42 }
 0x233   : > { %v883_v54 = vadd.f32 %v1431_v61, %v808_v48 }
 0x234   : > { %v810_v43 = vpop.f32.mrf.mxu2 }
 0x235   : > { %v892_v60 = vpack.c.bf16 %v883_v54, %v882_v57 }
 0x238   : > { %v761_v44 = vpop.f32.mrf.mxu1 }
 0x239   : > { %v811_v45 = vadd.f32 %v810_v43, %v761_v44 }
 0x23b   : > { %v884_v51 = vadd.f32 %v1431_v61, %v811_v45 }
 0x23c   : > { %v812_v46 = vpop.f32.mrf.mxu2 }
 0x240   : > { %v763_v47 = vpop.f32.mrf.mxu1 }
 0x241   : > { %v813_v49 = vadd.f32 %v812_v46, %v763_v47 }
 0x243   : > { %v885_v52 = vadd.f32 %v1431_v61, %v813_v49 }
 0x245   : > { %v893_v55 = vpack.c.bf16 %v885_v52, %v884_v51 }
 0x247   : > { %896 = vmatpush.bf16.msrb.mxu3 %v893_v55 }
 0x24b   : > { %897 = vmatpush.bf16.msrb.mxu3 %v892_v60 }
 0x24f   : > { %898 = vmatpush.bf16.msrb.mxu3 %v891_v2 }
 0x253   : > { %899 = vmatpush.bf16.msrb.mxu3 %v890_v5 }
 0x257   : > { %900 = vmatpush.bf16.msrb.mxu3 %v889_v30 }
 0x25b   : > { %901 = vmatpush.bf16.msrb.mxu3 %v888_v21 }
 0x25f   : > { %902 = vmatpush.bf16.msrb.mxu3 %v887_v12 }
 0x263   : > { %903 = vmatpush.bf16.msrb.mxu3 %v886_v3 }
 0x266   : > { %904 = vmatmul.bf16.vlgmr.msrb.gmra.mxu3 %v895_v6 }
 0x2e9   : > { %v905_v8 = vpop.f32.mrf.mxu3 }
 0x2ea   : > { %v909_v9 = vadd.f32 %v905_v8, %v894_v7 }
 0x2ec   : > { %910 = vst [vmem:[%s1482_s5] sm:$0xff] %v909_v9 }
 0x2f1   : > { %v907_v61 = vpop.f32.mrf.mxu3 }
 0x2f2 PF: > { %s15_s20 = sadd.s32 1, %s1251_s20   ;;  %s1483_s18 = smov %s1247_s19 }
 0x2f3   : > { %p12_p7 = scmp.ge.s32.totalorder %s15_s20, 4   ;;  %s1484_s19 = smov %s1486_s21 }
 0x2f5   :  { %14 = sbr.rel (!%p12_p7) target bundleno = 2 (0x2), region = 84 }

// kernel: gcn_forward.3
= control target key start
LH: loop header
LB: loop body
LE: loop exit
PB: predicated region body
PF: predicated region fallthrough
CT: control target
= control target key end

     0   :  { %s1697_s15 = smov 0   ;;  %s1699_s16 = smov 0   ;;  %s1973_s0 = inlined_call_operand.vmem [shape: bf16[256,256], index: 0, kind: input, shape index: {}]   ;;  %s1974_s1 = inlined_call_operand.vmem [shape: bf16[256,128], index: 1, kind: input, shape index: {}]   ;;  %s1975_s2 = inlined_call_operand.vmem [shape: bf16[128,128], index: 2, kind: input, shape index: {}]   ;;  %s1976_s3 = inlined_call_operand.vmem [shape: f32[1,128], index: 3, kind: input, shape index: {}]   ;;  %s1977_s4 = inlined_call_operand.vmem [shape: bf16[256,128], index: 4, kind: output, shape index: {}]  }
   0x1   :  { %s1701_s17 = smov 0  }
   0x2 LB: > { %s26_s18 = sadd.s32 1, %s1666_s16  ;;  %p1279_p0 = scmp.ge.s32.totalorder %s1670_s17, 1  ;;  %s1670_s17 = sphi %s1701_s17, %s14_s17   ;;  %s1666_s16 = sphi %s1699_s16, %s1991_s16   ;;  %s1662_s15 = sphi %s1697_s15, %s1990_s15  }
   0x3   : > { %p28_p1 = scmp.ge.s32.totalorder %s26_s18, 2  ;;  %p194_p2 = scmp.lt.s32.totalorder %s1670_s17, 3 }
   0x5   : > { %s1993_s18 = smov (%p28_p1, %s26_s18), 0  ;;  %p195_p3 = pnand %p1279_p0, %p194_p2 }
   0x6   : > { %s1280_s23 = sshll.u32 (!%p195_p3), %s1662_s15, 4 }
   0x7   : > { %198 = sbr.rel (%p195_p3) target bundleno = 616 (0x268), region = 36  ;;  %p232_p4 = scmp.lt.s32.totalorder (!%p195_p3), %s1280_s23, 31 }
   0xc   : > { %v1487_v0 = vld [vmem:[%s1975_s2 + $0x38] sm:$0xff]  ;;  %v1486_v1 = vld [vmem:[%s1975_s2 + $0x30] sm:$0xff]  ;;  %v1485_v2 = vld [vmem:[%s1975_s2 + $0x28] sm:$0xff]  ;;  %s1995_s23 = smov (!%p232_p4, %s1280_s23), 31 }
   0xd   : > { %466 = vmatpush.bf16.msra.mxu0 %v1487_v0  ;;  %1551 = vmatpush.bf16.msra.mxu3 %v1487_v0  ;;  %v1484_v3 = vld [vmem:[%s1975_s2 + $0x20] sm:$0xff]  ;;  %v1483_v4 = vld [vmem:[%s1975_s2 + $0x18] sm:$0xff]  ;;  %v1482_v5 = vld [vmem:[%s1975_s2 + $0x10] sm:$0xff]  ;;  %s1463_s24 = sshll.u32 %s1995_s23, 3  ;;  %s1284_s29 = sshll.u32 %s1995_s23, 2 }
   0xe   : > { %v1481_v6 = vld [vmem:[%s1975_s2 + $0x8] sm:$0xff]  ;;  %v1480_v7 = vld [vmem:[%s1975_s2] sm:$0xff]  ;;  %v1466_v12 = vld [vmem:[%s1974_s1 + $0x10] sm:$0xff]  ;;  %s1811_s15 = scalar_lea.vmem %s1973_s0, %s1463_s24  ;;  %s1875_s6 = scalar_lea.vmem %s1977_s4, %s1284_s29 }
   0xf   : > { %v1464_v8 = vld [vmem:[%s1974_s1] sm:$0xff]  ;;  %v1465_v10 = vld [vmem:[%s1974_s1 + $0x8] sm:$0xff]  ;;  %v1474_v13 = vld [vmem:[%s1974_s1 + $0x50] sm:$0xff] }
  0x10   : > { %v1472_v9 = vld [vmem:[%s1974_s1 + $0x40] sm:$0xff]  ;;  %v1473_v11 = vld [vmem:[%s1974_s1 + $0x48] sm:$0xff]  ;;  %v1467_v14 = vld [vmem:[%s1974_s1 + $0x18] sm:$0xff] }
  0x11   : > { %467 = vmatpush.bf16.msra.mxu0 %v1486_v1  ;;  %1552 = vmatpush.bf16.msra.mxu3 %v1486_v1  ;;  %v1475_v15 = vld [vmem:[%s1974_s1 + $0x58] sm:$0xff]  ;;  %v1468_v16 = vld [vmem:[%s1974_s1 + $0x20] sm:$0xff]  ;;  %v1469_v18 = vld [vmem:[%s1974_s1 + $0x28] sm:$0xff] }
  0x12   : > { %v1476_v17 = vld [vmem:[%s1974_s1 + $0x60] sm:$0xff]  ;;  %v1477_v19 = vld [vmem:[%s1974_s1 + $0x68] sm:$0xff]  ;;  %v1470_v20 = vld [vmem:[%s1974_s1 + $0x30] sm:$0xff] }
  0x13   : > { %v1478_v21 = vld [vmem:[%s1974_s1 + $0x70] sm:$0xff]  ;;  %v1471_v22 = vld [vmem:[%s1974_s1 + $0x38] sm:$0xff] }
  0x14   : > { %v1479_v23 = vld [vmem:[%s1974_s1 + $0x78] sm:$0xff] }
  0x15   : > { %468 = vmatpush.bf16.msra.mxu0 %v1485_v2  ;;  %1553 = vmatpush.bf16.msra.mxu3 %v1485_v2 }
  0x19   : > { %469 = vmatpush.bf16.msra.mxu0 %v1484_v3  ;;  %1554 = vmatpush.bf16.msra.mxu3 %v1484_v3 }
  0x1d   : > { %470 = vmatpush.bf16.msra.mxu0 %v1483_v4  ;;  %1555 = vmatpush.bf16.msra.mxu3 %v1483_v4 }
  0x21   : > { %471 = vmatpush.bf16.msra.mxu0 %v1482_v5  ;;  %1556 = vmatpush.bf16.msra.mxu3 %v1482_v5 }
  0x25   : > { %472 = vmatpush.bf16.msra.mxu0 %v1481_v6  ;;  %1557 = vmatpush.bf16.msra.mxu3 %v1481_v6 }
  0x29   : > { %473 = vmatpush.bf16.msra.mxu0 %v1480_v7  ;;  %1558 = vmatpush.bf16.msra.mxu3 %v1480_v7 }
  0x2c   : > { %474 = vmatmul.bf16.vlgmr.msra.gmra.mxu0 %v1464_v8  ;;  %514 = vmatmul.bf16.vlgmr.msra.gmra.mxu3 %v1472_v9  ;;  %v1383_v8 = vld [vmem:[%s1811_s15] sm:$0xf]  ;;  %v1489_v9 = vld [vmem:[%s1811_s15 + $0x4] sm:$0xf0] }
  0x3c   : > { %479 = vmatmul.bf16.gmra.mxu0 %v1465_v10  ;;  %519 = vmatmul.bf16.gmra.mxu3 %v1473_v11  ;;  %v1384_v10 = vor.u32 %v1489_v9, %v1383_v8  ;;  %v1488_v11 = vld [vmem:[%s1811_s15 + $0x4] sm:$0xf] }
  0x4c   : > { %484 = vmatmul.bf16.gmra.mxu0 %v1466_v12  ;;  %524 = vmatmul.bf16.gmra.mxu3 %v1474_v13  ;;  %v1385_v12 = vld [vmem:[%s1811_s15 + $0x8] sm:$0xf0] }
  0x4d   : > { %v1388_v13 = vor.u32 %v1488_v11, %v1385_v12 }
  0x5c   : > { %489 = vmatmul.bf16.gmra.mxu0 %v1467_v14  ;;  %529 = vmatmul.bf16.gmra.mxu3 %v1475_v15  ;;  %v1391_v14 = vld [vmem:[%s1811_s15 + $0x10] sm:$0xf]  ;;  %v1491_v15 = vld [vmem:[%s1811_s15 + $0x14] sm:$0xf0] }
  0x6c   : > { %494 = vmatmul.bf16.gmra.mxu0 %v1468_v16  ;;  %534 = vmatmul.bf16.gmra.mxu3 %v1476_v17  ;;  %v1392_v16 = vor.u32 %v1491_v15, %v1391_v14  ;;  %v1490_v17 = vld [vmem:[%s1811_s15 + $0x14] sm:$0xf] }
  0x7c   : > { %499 = vmatmul.bf16.gmra.mxu0 %v1469_v18  ;;  %539 = vmatmul.bf16.gmra.mxu3 %v1477_v19  ;;  %v1393_v18 = vld [vmem:[%s1811_s15 + $0x18] sm:$0xf0] }
  0x7d   : > { %v1396_v19 = vor.u32 %v1490_v17, %v1393_v18 }
  0x8c   : > { %504 = vmatmul.bf16.gmra.mxu0 %v1470_v20  ;;  %544 = vmatmul.bf16.gmra.mxu3 %v1478_v21  ;;  %v1399_v20 = vld [vmem:[%s1811_s15 + $0x20] sm:$0xf]  ;;  %v1493_v21 = vld [vmem:[%s1811_s15 + $0x24] sm:$0xf0] }
  0x9c   : > { %509 = vmatmul.bf16.gmra.mxu0 %v1471_v22  ;;  %549 = vmatmul.bf16.gmra.mxu3 %v1479_v23  ;;  %v1400_v22 = vor.u32 %v1493_v21, %v1399_v20  ;;  %v1492_v23 = vld [vmem:[%s1811_s15 + $0x24] sm:$0xf] }
  0xa9   : > { %v1789_v24 = vpop.f32.mrf.mxu0 }
  0xaf   : > { %v1791_v25 = vpop.f32.mrf.mxu3 }
  0xb1   : > { %v1793_v26 = vpop.f32.mrf.mxu0 }
  0xb2   : > { %v587_v27 = vpack.c.bf16 %v1793_v26, %v1789_v24  ;;  %v1401_v24 = vld [vmem:[%s1811_s15 + $0x28] sm:$0xf0]  ;;  %v1407_v26 = vld [vmem:[%s1811_s15 + $0x30] sm:$0xf] }
  0xb7   : > { %v1797_v28 = vpop.f32.mrf.mxu3 }
  0xb8   : > { %v595_v29 = vpack.c.bf16 %v1797_v28, %v1791_v25  ;;  %v1404_v25 = vor.u32 %v1492_v23, %v1401_v24 }
  0xb9   : > { %v480_v30 = vpop.f32.mrf.mxu0 }
  0xbf   : > { %v1801_v31 = vpop.f32.mrf.mxu3 }
  0xc1   : > { %v482_v32 = vpop.f32.mrf.mxu0 }
  0xc2   : > { %v588_v33 = vpack.c.bf16 %v482_v32, %v480_v30  ;;  %v1409_v30 = vld [vmem:[%s1811_s15 + $0x38] sm:$0xf0]  ;;  %v1415_v32 = vld [vmem:[%s1811_s15 + $0x40] sm:$0xf] }
  0xc7   : > { %v522_v34 = vpop.f32.mrf.mxu3 }
  0xc8   : > { %v596_v35 = vpack.c.bf16 %v522_v34, %v1801_v31 }
  0xc9   : > { %v485_v36 = vpop.f32.mrf.mxu0 }
  0xcf   : > { %v525_v37 = vpop.f32.mrf.mxu3 }
  0xd1   : > { %v487_v38 = vpop.f32.mrf.mxu0 }
  0xd2   : > { %v589_v39 = vpack.c.bf16 %v487_v38, %v485_v36  ;;  %v1417_v36 = vld [vmem:[%s1811_s15 + $0x48] sm:$0xf0]  ;;  %v1423_v38 = vld [vmem:[%s1811_s15 + $0x50] sm:$0xf] }
  0xd7   : > { %v527_v40 = vpop.f32.mrf.mxu3 }
  0xd8   : > { %v597_v41 = vpack.c.bf16 %v527_v40, %v525_v37 }
  0xd9   : > { %v490_v42 = vpop.f32.mrf.mxu0 }
  0xdf   : > { %v530_v43 = vpop.f32.mrf.mxu3 }
  0xe1   : > { %v492_v44 = vpop.f32.mrf.mxu0 }
  0xe2   : > { %v590_v45 = vpack.c.bf16 %v492_v44, %v490_v42  ;;  %v1425_v42 = vld [vmem:[%s1811_s15 + $0x58] sm:$0xf0]  ;;  %v1431_v44 = vld [vmem:[%s1811_s15 + $0x60] sm:$0xf] }
  0xe7   : > { %v532_v46 = vpop.f32.mrf.mxu3 }
  0xe8   : > { %v598_v47 = vpack.c.bf16 %v532_v46, %v530_v43 }
  0xe9   : > { %v495_v48 = vpop.f32.mrf.mxu0 }
  0xef   : > { %v535_v49 = vpop.f32.mrf.mxu3 }
  0xf1   : > { %v497_v50 = vpop.f32.mrf.mxu0 }
  0xf2   : > { %v591_v5 = vpack.c.bf16 %v497_v50, %v495_v48  ;;  %v1433_v48 = vld [vmem:[%s1811_s15 + $0x68] sm:$0xf0]  ;;  %v1439_v50 = vld [vmem:[%s1811_s15 + $0x70] sm:$0xf] }
  0xf7   : > { %v537_v51 = vpop.f32.mrf.mxu3 }
  0xf8   : > { %v599_v7 = vpack.c.bf16 %v537_v51, %v535_v49  ;;  %v1503_v51 = vld [vmem:[%s1811_s15 + $0x74] sm:$0xf0] }
  0xf9   : > { %v500_v52 = vpop.f32.mrf.mxu0 }
  0xff   : > { %v540_v53 = vpop.f32.mrf.mxu3 }
 0x101   : > { %v502_v54 = vpop.f32.mrf.mxu0 }
 0x102   : > { %v592_v3 = vpack.c.bf16 %v502_v54, %v500_v52  ;;  %v1440_v52 = vor.u32 %v1503_v51, %v1439_v50  ;;  %v1441_v54 = vld [vmem:[%s1811_s15 + $0x78] sm:$0xf0] }
 0x107   : > { %v542_v55 = vpop.f32.mrf.mxu3 }
 0x108   : > { %v600_v6 = vpack.c.bf16 %v542_v55, %v540_v53  ;;  %v1502_v53 = vld [vmem:[%s1811_s15 + $0x74] sm:$0xf] }
 0x109   : > { %v505_v56 = vpop.f32.mrf.mxu0  ;;  %v1444_v55 = vor.u32 %v1502_v53, %v1441_v54 }
 0x10f   : > { %v545_v57 = vpop.f32.mrf.mxu3 }
 0x111   : > { %v507_v58 = vpop.f32.mrf.mxu0 }
 0x112   : > { %v593_v0 = vpack.c.bf16 %v507_v58, %v505_v56  ;;  %v1854_v58 = vld [vmem:[%s1976_s3] ss:$0 sm:$0xff] }
 0x117   : > { %v547_v59 = vpop.f32.mrf.mxu3 }
 0x118   : > { %v601_v4 = vpack.c.bf16 %v547_v59, %v545_v57 }
 0x119   : > { %v510_v60 = vpop.f32.mrf.mxu0 }
 0x11f   : > { %v550_v61 = vpop.f32.mrf.mxu3 }
 0x121   : > { %v512_v62 = vpop.f32.mrf.mxu0 }
 0x122   : > { %v594_v63 = vpack.c.bf16 %v512_v62, %v510_v60 }
 0x124   : > { %683 = vmatpush.bf16.msra.mxu1 %v594_v63 }
 0x127   : > { %v552_v1 = vpop.f32.mrf.mxu3 }
 0x128   : > { %684 = vmatpush.bf16.msra.mxu1 %v593_v0  ;;  %v602_v2 = vpack.c.bf16 %v552_v1, %v550_v61 }
 0x12a   : > { %732 = vmatpush.bf16.msra.mxu2 %v602_v2 }
 0x12c   : > { %685 = vmatpush.bf16.msra.mxu1 %v592_v3 }
 0x12e   : > { %733 = vmatpush.bf16.msra.mxu2 %v601_v4 }
 0x130   : > { %686 = vmatpush.bf16.msra.mxu1 %v591_v5 }
 0x132   : > { %734 = vmatpush.bf16.msra.mxu2 %v600_v6 }
 0x134   : > { %687 = vmatpush.bf16.msra.mxu1 %v590_v45  ;;  %v1501_v45 = vld [vmem:[%s1811_s15 + $0x64] sm:$0xf0] }
 0x135   : > { %v1432_v46 = vor.u32 %v1501_v45, %v1431_v44 }
 0x136   : > { %735 = vmatpush.bf16.msra.mxu2 %v599_v7 }
 0x138   : > { %688 = vmatpush.bf16.msra.mxu1 %v589_v39  ;;  %v1499_v39 = vld [vmem:[%s1811_s15 + $0x54] sm:$0xf0] }
 0x139   : > { %v1424_v40 = vor.u32 %v1499_v39, %v1423_v38 }
 0x13a   : > { %736 = vmatpush.bf16.msra.mxu2 %v598_v47  ;;  %v1500_v47 = vld [vmem:[%s1811_s15 + $0x64] sm:$0xf] }
 0x13b   : > { %v1436_v49 = vor.u32 %v1500_v47, %v1433_v48 }
 0x13c   : > { %689 = vmatpush.bf16.msra.mxu1 %v588_v33  ;;  %v1497_v33 = vld [vmem:[%s1811_s15 + $0x44] sm:$0xf0] }
 0x13d   : > { %v1416_v34 = vor.u32 %v1497_v33, %v1415_v32 }
 0x13e   : > { %737 = vmatpush.bf16.msra.mxu2 %v597_v41  ;;  %v1498_v41 = vld [vmem:[%s1811_s15 + $0x54] sm:$0xf] }
 0x13f   : > { %v1428_v43 = vor.u32 %v1498_v41, %v1425_v42 }
 0x140   : > { %690 = vmatpush.bf16.msra.mxu1 %v587_v27  ;;  %v1495_v27 = vld [vmem:[%s1811_s15 + $0x34] sm:$0xf0] }
 0x141   : > { %v1408_v28 = vor.u32 %v1495_v27, %v1407_v26 }
 0x142   : > { %738 = vmatpush.bf16.msra.mxu2 %v596_v35  ;;  %v1496_v35 = vld [vmem:[%s1811_s15 + $0x44] sm:$0xf] }
 0x143   : > { %691 = vmatmul.bf16.vlgmr.msra.gmra.mxu1 %v1384_v10  ;;  %v1420_v37 = vor.u32 %v1496_v35, %v1417_v36 }
 0x146   : > { %739 = vmatpush.bf16.msra.mxu2 %v595_v29  ;;  %v1494_v29 = vld [vmem:[%s1811_s15 + $0x34] sm:$0xf] }
 0x147   : > { %v1412_v31 = vor.u32 %v1494_v29, %v1409_v30 }
 0x149   : > { %740 = vmatmul.bf16.vlgmr.msra.gmra.mxu2 %v1388_v13 }
 0x153   : > { %696 = vmatmul.bf16.gmra.mxu1 %v1392_v16 }
 0x159   : > { %745 = vmatmul.bf16.gmra.mxu2 %v1396_v19 }
 0x163   : > { %701 = vmatmul.bf16.gmra.mxu1 %v1400_v22 }
 0x169   : > { %750 = vmatmul.bf16.gmra.mxu2 %v1404_v25 }
 0x173   : > { %706 = vmatmul.bf16.gmra.mxu1 %v1408_v28 }
 0x179   : > { %755 = vmatmul.bf16.gmra.mxu2 %v1412_v31 }
 0x183   : > { %711 = vmatmul.bf16.gmra.mxu1 %v1416_v34 }
 0x189   : > { %760 = vmatmul.bf16.gmra.mxu2 %v1420_v37 }
 0x193   : > { %716 = vmatmul.bf16.gmra.mxu1 %v1424_v40 }
 0x199   : > { %765 = vmatmul.bf16.gmra.mxu2 %v1428_v43 }
 0x1a3   : > { %721 = vmatmul.bf16.gmra.mxu1 %v1432_v46 }
 0x1a9   : > { %770 = vmatmul.bf16.gmra.mxu2 %v1436_v49 }
 0x1b3   : > { %726 = vmatmul.bf16.gmra.mxu1 %v1440_v52 }
 0x1b9   : > { %775 = vmatmul.bf16.gmra.mxu2 %v1444_v55 }
 0x1c0   : > { %v692_v56 = vpop.f32.mrf.mxu1 }
 0x1c8   : > { %v694_v57 = vpop.f32.mrf.mxu1 }
 0x1cc   : > { %v741_v59 = vpop.f32.mrf.mxu2 }
 0x1cd   : > { %v742_v60 = vadd.f32 %v741_v59, %v692_v56 }
 0x1cf   : > { %v836_v61 = vadd.f32 %v1854_v58, %v742_v60 }
 0x1d0   : > { %v697_v62 = vpop.f32.mrf.mxu1 }
 0x1d1   : > { %v1445_v63 = vmul.f32 -1.442695, %v836_v61 }
 0x1d3   : > { %1584 = vpow2.f32 %v1445_v63 }
 0x1d4   : > { %v743_v0 = vpop.f32.mrf.mxu2 }
 0x1d5   : > { %v744_v1 = vadd.f32 %v743_v0, %v694_v57 }
 0x1d7   : > { %v837_v2 = vadd.f32 %v1854_v58, %v744_v1 }
 0x1d8   : > { %v699_v3 = vpop.f32.mrf.mxu1 }
 0x1d9   : > { %v1585_v4 = vpop.eup %1584  ;;  %v1446_v5 = vmul.f32 -1.442695, %v837_v2 }
 0x1da   : > { %v900_v6 = vadd.f32 1.0, %v1585_v4 }
 0x1db   : > { %1586 = vpow2.f32 %v1446_v5 }
 0x1dc   : > { %1588 = vrcp.f32 %v900_v6  ;;  %v746_v7 = vpop.f32.mrf.mxu2  ;;  %vm921_vm1 = vweird.f32 %v900_v6  ;;  %v925_v31 = vand.u32 2147483647, %v900_v6  ;;  %v927_v32 = vand.u32 2147483648, %v900_v6 }
 0x1dd   : > { %v747_v8 = vadd.f32 %v746_v7, %v697_v62 }
 0x1de   : > { %vm926_vm5 = vcmp.eq.f32.partialorder %v925_v31, 8.507059e+37  ;;  %v928_v44 = vor.u32 1.1754944e-38, %v927_v32 }
 0x1df   : > { %v838_v9 = vadd.f32 %v1854_v58, %v747_v8 }
 0x1e0   : > { %v702_v10 = vpop.f32.mrf.mxu1 }
 0x1e1   : > { %v1587_v11 = vpop.eup %1586  ;;  %v1447_v12 = vmul.f32 -1.442695, %v838_v9 }
 0x1e2   : > { %v1589_v13 = vpop.eup %1588  ;;  %v901_v14 = vadd.f32 1.0, %v1587_v11 }
 0x1e3   : > { %v917_v15 = vmul.f32 %v1589_v13, %v900_v6  ;;  %1590 = vpow2.f32 %v1447_v12  ;;  %vm922_vm0 = vweird.f32 %v1589_v13 }
 0x1e4   : > { %1592 = vrcp.f32 %v901_v14  ;;  %v748_v16 = vpop.f32.mrf.mxu2  ;;  %v942_v33 = vand.u32 2147483648, %v901_v14  ;;  %v940_v35 = vand.u32 2147483647, %v901_v14  ;;  %vm1864_vm3 = vmor %vm921_vm1, %vm922_vm0  ;;  %vm936_vm4 = vweird.f32 %v901_v14 }
 0x1e5   : > { %v918_v17 = vsub.f32 1.0, %v917_v15  ;;  %v749_v18 = vadd.f32 %v748_v16, %v699_v3 }
 0x1e6   : > { %v943_v45 = vor.u32 1.1754944e-38, %v942_v33  ;;  %vm941_vm7 = vcmp.eq.f32.partialorder %v940_v35, 8.507059e+37 }
 0x1e7   : > { %v839_v19 = vadd.f32 %v1854_v58, %v749_v18  ;;  %v919_v22 = vmul.f32 %v1589_v13, %v918_v17 }
 0x1e8   : > { %v704_v20 = vpop.f32.mrf.mxu1 }
 0x1e9   : > { %v1591_v21 = vpop.eup %1590  ;;  %v1448_v23 = vmul.f32 -1.442695, %v839_v19  ;;  %v920_v28 = vadd.f32 %v1589_v13, %v919_v22 }
 0x1ea   : > { %v1593_v24 = vpop.eup %1592  ;;  %v1860_v25 = vadd.f32 1.0, %v1591_v21 }
 0x1eb   : > { %v932_v26 = vmul.f32 %v1593_v24, %v901_v14  ;;  %1594 = vpow2.f32 %v1448_v23  ;;  %vm937_vm2 = vweird.f32 %v1593_v24  ;;  %v924_v40 = vsel %vm1864_vm3, %v1589_v13, %v920_v28 }
 0x1ec   : > { %1596 = vrcp.f32 %v1860_v25  ;;  %v751_v27 = vpop.f32.mrf.mxu2  ;;  %vm938_vm6 = vmor %vm936_vm4, %vm937_vm2  ;;  %v929_v49 = vsel %vm926_vm5, %v928_v44, %v924_v40  ;;  %vm951_vm9 = vweird.f32 %v1860_v25  ;;  %v955_v4 = vand.u32 2147483647, %v1860_v25 }
 0x1ed   : > { %v933_v29 = vsub.f32 1.0, %v932_v26  ;;  %v752_v30 = vadd.f32 %v751_v27, %v702_v10  ;;  %v957_v5 = vand.u32 2147483648, %v1860_v25 }
 0x1ee   : > { %vm956_vm13 = vcmp.eq.f32.partialorder %v955_v4, 8.507059e+37 }
 0x1ef   : > { %v934_v34 = vmul.f32 %v1593_v24, %v933_v29  ;;  %v840_v36 = vadd.f32 %v1854_v58, %v752_v30  ;;  %v958_v17 = vor.u32 1.1754944e-38, %v957_v5 }
 0x1f0   : > { %v707_v38 = vpop.f32.mrf.mxu1 }
 0x1f1   : > { %v1595_v39 = vpop.eup %1594  ;;  %v935_v41 = vadd.f32 %v1593_v24, %v934_v34  ;;  %v1449_v42 = vmul.f32 -1.442695, %v840_v36 }
 0x1f2   : > { %v1597_v43 = vpop.eup %1596  ;;  %v903_v46 = vadd.f32 1.0, %v1595_v39 }
 0x1f3   : > { %v939_v47 = vsel %vm938_vm6, %v1593_v24, %v935_v41  ;;  %v947_v48 = vmul.f32 %v1597_v43, %v1860_v25  ;;  %1598 = vpow2.f32 %v1449_v42  ;;  %vm952_vm8 = vweird.f32 %v1597_v43 }
 0x1f4   : > { %v944_v50 = vsel %vm941_vm7, %v943_v45, %v939_v47  ;;  %1600 = vrcp.f32 %v903_v46  ;;  %v753_v51 = vpop.f32.mrf.mxu2  ;;  %v972_v6 = vand.u32 2147483648, %v903_v46  ;;  %v970_v8 = vand.u32 2147483647, %v903_v46  ;;  %vm1886_vm11 = vmor %vm951_vm9, %vm952_vm8 }
 0x1f5   : > { %v1507_v52 = vpack.c.bf16 %v944_v50, %v929_v49  ;;  %v948_v53 = vsub.f32 1.0, %v947_v48  ;;  %v754_v54 = vadd.f32 %v753_v51, %v704_v20  ;;  %vm966_vm12 = vweird.f32 %v903_v46 }
 0x1f6   : > { %v973_v18 = vor.u32 1.1754944e-38, %v972_v6  ;;  %vm971_vm15 = vcmp.eq.f32.partialorder %v970_v8, 8.507059e+37 }
 0x1f7   : > { %1508 = vst [vmem:[%s1875_s6] sm:$0xff] %v1507_v52   ;;  %v841_v55 = vadd.f32 %v1854_v58, %v754_v54  ;;  %v949_v59 = vmul.f32 %v1597_v43, %v948_v53 }
 0x1f8   : > { %v709_v56 = vpop.f32.mrf.mxu1 }
 0x1f9   : > { %v1599_v57 = vpop.eup %1598  ;;  %v1450_v60 = vmul.f32 -1.442695, %v841_v55  ;;  %v950_v1 = vadd.f32 %v1597_v43, %v949_v59 }
 0x1fa   : > { %v1601_v61 = vpop.eup %1600  ;;  %v1879_v62 = vadd.f32 1.0, %v1599_v57 }
 0x1fb   : > { %v962_v63 = vmul.f32 %v1601_v61, %v903_v46  ;;  %1602 = vpow2.f32 %v1450_v60  ;;  %vm967_vm10 = vweird.f32 %v1601_v61  ;;  %v954_v13 = vsel %vm1886_vm11, %v1597_v43, %v950_v1 }
 0x1fc   : > { %1604 = vrcp.f32 %v1879_v62  ;;  %v756_v0 = vpop.f32.mrf.mxu2  ;;  %vm968_vm14 = vmor %vm966_vm12, %vm967_vm10  ;;  %v959_v22 = vsel %vm956_vm13, %v958_v17, %v954_v13  ;;  %vm981_vm1 = vweird.f32 %v1879_v62  ;;  %v985_v40 = vand.u32 2147483647, %v1879_v62 }
 0x1fd   : > { %v963_v2 = vsub.f32 1.0, %v962_v63  ;;  %v757_v3 = vadd.f32 %v756_v0, %v707_v38  ;;  %v987_v41 = vand.u32 2147483648, %v1879_v62 }
 0x1fe   : > { %vm986_vm5 = vcmp.eq.f32.partialorder %v985_v40, 8.507059e+37 }
 0x1ff   : > { %v964_v7 = vmul.f32 %v1601_v61, %v963_v2  ;;  %v842_v9 = vadd.f32 %v1854_v58, %v757_v3  ;;  %v988_v52 = vor.u32 1.1754944e-38, %v987_v41 }
 0x200   : > { %v712_v11 = vpop.f32.mrf.mxu1 }
 0x201   : > { %v1603_v12 = vpop.eup %1602  ;;  %v965_v14 = vadd.f32 %v1601_v61, %v964_v7  ;;  %v1451_v15 = vmul.f32 -1.442695, %v842_v9 }
 0x202   : > { %v1605_v16 = vpop.eup %1604  ;;  %v905_v19 = vadd.f32 1.0, %v1603_v12 }
 0x203   : > { %v969_v20 = vsel %vm968_vm14, %v1601_v61, %v965_v14  ;;  %v977_v21 = vmul.f32 %v1605_v16, %v1879_v62  ;;  %1606 = vpow2.f32 %v1451_v15  ;;  %vm982_vm0 = vweird.f32 %v1605_v16 }
 0x204   : > { %v974_v23 = vsel %vm971_vm15, %v973_v18, %v969_v20  ;;  %1608 = vrcp.f32 %v905_v19  ;;  %v758_v24 = vpop.f32.mrf.mxu2  ;;  %v1002_v42 = vand.u32 2147483648, %v905_v19  ;;  %v1000_v44 = vand.u32 2147483647, %v905_v19  ;;  %vm1902_vm3 = vmor %vm981_vm1, %vm982_vm0 }
 0x205   : > { %v1512_v25 = vpack.c.bf16 %v974_v23, %v959_v22  ;;  %v978_v26 = vsub.f32 1.0, %v977_v21  ;;  %v759_v27 = vadd.f32 %v758_v24, %v709_v56  ;;  %vm996_vm4 = vweird.f32 %v905_v19 }
 0x206   : > { %v1003_v53 = vor.u32 1.1754944e-38, %v1002_v42  ;;  %vm1001_vm7 = vcmp.eq.f32.partialorder %v1000_v44, 8.507059e+37 }
 0x207   : > { %1544 = vst [vmem:[%s1875_s6 + $0x8] sm:$0xff] %v1512_v25   ;;  %v843_v28 = vadd.f32 %v1854_v58, %v759_v27  ;;  %v979_v31 = vmul.f32 %v1605_v16, %v978_v26 }
 0x208   : > { %v714_v29 = vpop.f32.mrf.mxu1 }
 0x209   : > { %v1607_v30 = vpop.eup %1606  ;;  %v1452_v32 = vmul.f32 -1.442695, %v843_v28  ;;  %v980_v37 = vadd.f32 %v1605_v16, %v979_v31 }
 0x20a   : > { %v1609_v33 = vpop.eup %1608  ;;  %v1895_v34 = vadd.f32 1.0, %v1607_v30 }
 0x20b   : > { %v992_v35 = vmul.f32 %v1609_v33, %v905_v19  ;;  %1610 = vpow2.f32 %v1452_v32  ;;  %vm997_vm2 = vweird.f32 %v1609_v33  ;;  %v984_v48 = vsel %vm1902_vm3, %v1605_v16, %v980_v37 }
 0x20c   : > { %1612 = vrcp.f32 %v1895_v34  ;;  %v761_v36 = vpop.f32.mrf.mxu2  ;;  %vm998_vm6 = vmor %vm996_vm4, %vm997_vm2  ;;  %v989_v59 = vsel %vm986_vm5, %v988_v52, %v984_v48  ;;  %vm1011_vm9 = vweird.f32 %v1895_v34  ;;  %v1015_v13 = vand.u32 2147483647, %v1895_v34 }
 0x20d   : > { %v993_v38 = vsub.f32 1.0, %v992_v35  ;;  %v762_v39 = vadd.f32 %v761_v36, %v712_v11  ;;  %v1017_v14 = vand.u32 2147483648, %v1895_v34 }
 0x20e   : > { %vm1016_vm13 = vcmp.eq.f32.partialorder %v1015_v13, 8.507059e+37 }
 0x20f   : > { %v994_v43 = vmul.f32 %v1609_v33, %v993_v38  ;;  %v844_v45 = vadd.f32 %v1854_v58, %v762_v39  ;;  %v1018_v25 = vor.u32 1.1754944e-38, %v1017_v14 }
 0x210   : > { %v717_v55 = vpop.f32.mrf.mxu1 }
 0x211   : > { %v1611_v47 = vpop.eup %1610  ;;  %v995_v49 = vadd.f32 %v1609_v33, %v994_v43  ;;  %v1453_v50 = vmul.f32 -1.442695, %v844_v45 }
 0x212   : > { %v1613_v51 = vpop.eup %1612  ;;  %v907_v54 = vadd.f32 1.0, %v1611_v47 }
 0x213   : > { %v999_v56 = vsel %vm998_vm6, %v1609_v33, %v995_v49  ;;  %v1007_v57 = vmul.f32 %v1613_v51, %v1895_v34  ;;  %1614 = vpow2.f32 %v1453_v50  ;;  %vm1012_vm8 = vweird.f32 %v1613_v51 }
 0x214   : > { %v1004_v60 = vsel %vm1001_vm7, %v1003_v53, %v999_v56  ;;  %1616 = vrcp.f32 %v907_v54  ;;  %v763_v61 = vpop.f32.mrf.mxu2  ;;  %v1032_v15 = vand.u32 2147483648, %v907_v54  ;;  %v1030_v17 = vand.u32 2147483647, %v907_v54  ;;  %vm1918_vm11 = vmor %vm1011_vm9, %vm1012_vm8 }
 0x215   : > { %v1517_v62 = vpack.c.bf16 %v1004_v60, %v989_v59  ;;  %v1008_v63 = vsub.f32 1.0, %v1007_v57  ;;  %v764_v0 = vadd.f32 %v763_v61, %v714_v29  ;;  %vm1026_vm12 = vweird.f32 %v907_v54 }
 0x216   : > { %v1033_v26 = vor.u32 1.1754944e-38, %v1032_v15  ;;  %vm1031_vm15 = vcmp.eq.f32.partialorder %v1030_v17, 8.507059e+37 }
 0x217   : > { %1545 = vst [vmem:[%s1875_s6 + $0x10] sm:$0xff] %v1517_v62   ;;  %v845_v1 = vadd.f32 %v1854_v58, %v764_v0  ;;  %v1009_v3 = vmul.f32 %v1613_v51, %v1008_v63 }
 0x218   : > { %v719_v8 = vpop.f32.mrf.mxu1 }
 0x219   : > { %v1615_v2 = vpop.eup %1614  ;;  %v1454_v4 = vmul.f32 -1.442695, %v845_v1  ;;  %v1010_v10 = vadd.f32 %v1613_v51, %v1009_v3 }
 0x21a   : > { %v1617_v5 = vpop.eup %1616  ;;  %v1911_v6 = vadd.f32 1.0, %v1615_v2 }
 0x21b   : > { %v1022_v7 = vmul.f32 %v1617_v5, %v907_v54  ;;  %1618 = vpow2.f32 %v1454_v4  ;;  %vm1027_vm10 = vweird.f32 %v1617_v5  ;;  %v1014_v21 = vsel %vm1918_vm11, %v1613_v51, %v1010_v10 }
 0x21c   : > { %1620 = vrcp.f32 %v1911_v6  ;;  %v766_v9 = vpop.f32.mrf.mxu2  ;;  %vm1028_vm14 = vmor %vm1026_vm12, %vm1027_vm10  ;;  %v1019_v30 = vsel %vm1016_vm13, %v1018_v25, %v1014_v21  ;;  %vm1041_vm1 = vweird.f32 %v1911_v6  ;;  %v1045_v48 = vand.u32 2147483647, %v1911_v6 }
 0x21d   : > { %v1023_v11 = vsub.f32 1.0, %v1022_v7  ;;  %v767_v12 = vadd.f32 %v766_v9, %v717_v55  ;;  %v1047_v49 = vand.u32 2147483648, %v1911_v6 }
 0x21e   : > { %vm1046_vm5 = vcmp.eq.f32.partialorder %v1045_v48, 8.507059e+37 }
 0x21f   : > { %v1024_v16 = vmul.f32 %v1617_v5, %v1023_v11  ;;  %v846_v18 = vadd.f32 %v1854_v58, %v767_v12  ;;  %v1048_v62 = vor.u32 1.1754944e-38, %v1047_v49 }
 0x220   : > { %v722_v36 = vpop.f32.mrf.mxu1 }
 0x221   : > { %v1619_v20 = vpop.eup %1618  ;;  %v1025_v22 = vadd.f32 %v1617_v5, %v1024_v16  ;;  %v1455_v23 = vmul.f32 -1.442695, %v846_v18 }
 0x222   : > { %v1621_v24 = vpop.eup %1620  ;;  %v909_v27 = vadd.f32 1.0, %v1619_v20 }
 0x223   : > { %v1029_v28 = vsel %vm1028_vm14, %v1617_v5, %v1025_v22  ;;  %v1037_v29 = vmul.f32 %v1621_v24, %v1911_v6  ;;  %1622 = vpow2.f32 %v1455_v23  ;;  %vm1042_vm0 = vweird.f32 %v1621_v24 }
 0x224   : > { %v1034_v31 = vsel %vm1031_vm15, %v1033_v26, %v1029_v28  ;;  %1624 = vrcp.f32 %v909_v27  ;;  %v768_v32 = vpop.f32.mrf.mxu2  ;;  %v1062_v50 = vand.u32 2147483648, %v909_v27  ;;  %v1060_v52 = vand.u32 2147483647, %v909_v27  ;;  %vm1934_vm3 = vmor %vm1041_vm1, %vm1042_vm0 }
 0x225   : > { %v1522_v33 = vpack.c.bf16 %v1034_v31, %v1019_v30  ;;  %v1038_v34 = vsub.f32 1.0, %v1037_v29  ;;  %v769_v35 = vadd.f32 %v768_v32, %v719_v8  ;;  %vm1056_vm4 = vweird.f32 %v909_v27 }
 0x226   : > { %v1063_v63 = vor.u32 1.1754944e-38, %v1062_v50  ;;  %vm1061_vm7 = vcmp.eq.f32.partialorder %v1060_v52, 8.507059e+37 }
 0x227   : > { %1546 = vst [vmem:[%s1875_s6 + $0x18] sm:$0xff] %v1522_v33   ;;  %v847_v37 = vadd.f32 %v1854_v58, %v769_v35  ;;  %v1039_v39 = vmul.f32 %v1621_v24, %v1038_v34 }
 0x228   : > { %v724_v55 = vpop.f32.mrf.mxu1 }
 0x229   : > { %v1623_v38 = vpop.eup %1622  ;;  %v1456_v40 = vmul.f32 -1.442695, %v847_v37  ;;  %v1040_v45 = vadd.f32 %v1621_v24, %v1039_v39 }
 0x22a   : > { %v1625_v41 = vpop.eup %1624  ;;  %v1927_v42 = vadd.f32 1.0, %v1623_v38 }
 0x22b   : > { %v1052_v43 = vmul.f32 %v1625_v41, %v909_v27  ;;  %1626 = vpow2.f32 %v1456_v40  ;;  %vm1057_vm2 = vweird.f32 %v1625_v41  ;;  %v1044_v57 = vsel %vm1934_vm3, %v1621_v24, %v1040_v45 }
 0x22c   : > { %1628 = vrcp.f32 %v1927_v42  ;;  %v771_v44 = vpop.f32.mrf.mxu2  ;;  %vm1058_vm6 = vmor %vm1056_vm4, %vm1057_vm2  ;;  %v1049_v3 = vsel %vm1046_vm5, %v1048_v62, %v1044_v57  ;;  %vm1071_vm9 = vweird.f32 %v1927_v42  ;;  %v1075_v21 = vand.u32 2147483647, %v1927_v42 }
 0x22d   : > { %v1053_v46 = vsub.f32 1.0, %v1052_v43  ;;  %v772_v47 = vadd.f32 %v771_v44, %v722_v36  ;;  %v1077_v22 = vand.u32 2147483648, %v1927_v42 }
 0x22e   : > { %vm1076_vm13 = vcmp.eq.f32.partialorder %v1075_v21, 8.507059e+37 }
 0x22f   : > { %v1054_v51 = vmul.f32 %v1625_v41, %v1053_v46  ;;  %v848_v53 = vadd.f32 %v1854_v58, %v772_v47  ;;  %v1078_v33 = vor.u32 1.1754944e-38, %v1077_v22 }
 0x230   : > { %v727_v15 = vpop.f32.mrf.mxu1 }
 0x231   : > { %v1627_v56 = vpop.eup %1626  ;;  %v1055_v59 = vadd.f32 %v1625_v41, %v1054_v51  ;;  %v1457_v60 = vmul.f32 -1.442695, %v848_v53 }
 0x232   : > { %v1629_v61 = vpop.eup %1628  ;;  %v911_v0 = vadd.f32 1.0, %v1627_v56 }
 0x233   : > { %v1059_v1 = vsel %vm1058_vm6, %v1625_v41, %v1055_v59  ;;  %v1067_v2 = vmul.f32 %v1629_v61, %v1927_v42  ;;  %1630 = vpow2.f32 %v1457_v60  ;;  %vm1072_vm8 = vweird.f32 %v1629_v61 }
 0x234   : > { %v1064_v4 = vsel %vm1061_vm7, %v1063_v63, %v1059_v1  ;;  %1632 = vrcp.f32 %v911_v0  ;;  %v773_v5 = vpop.f32.mrf.mxu2  ;;  %v1092_v23 = vand.u32 2147483648, %v911_v0  ;;  %v1090_v25 = vand.u32 2147483647, %v911_v0  ;;  %vm1950_vm11 = vmor %vm1071_vm9, %vm1072_vm8 }
 0x235   : > { %v1527_v6 = vpack.c.bf16 %v1064_v4, %v1049_v3  ;;  %v1068_v7 = vsub.f32 1.0, %v1067_v2  ;;  %v774_v8 = vadd.f32 %v773_v5, %v724_v55  ;;  %vm1086_vm12 = vweird.f32 %v911_v0 }
 0x236   : > { %v1093_v34 = vor.u32 1.1754944e-38, %v1092_v23  ;;  %vm1091_vm15 = vcmp.eq.f32.partialorder %v1090_v25, 8.507059e+37 }
 0x237   : > { %1547 = vst [vmem:[%s1875_s6 + $0x20] sm:$0xff] %v1527_v6   ;;  %v849_v9 = vadd.f32 %v1854_v58, %v774_v8  ;;  %v1069_v11 = vmul.f32 %v1629_v61, %v1068_v7 }
 0x238   : > { %v729_v40 = vpop.f32.mrf.mxu1 }
 0x239   : > { %v1631_v10 = vpop.eup %1630  ;;  %v1458_v12 = vmul.f32 -1.442695, %v849_v9  ;;  %v1070_v18 = vadd.f32 %v1629_v61, %v1069_v11 }
 0x23a   : > { %v1633_v13 = vpop.eup %1632  ;;  %v1943_v14 = vadd.f32 1.0, %v1631_v10 }
 0x23b   : > { %v1082_v16 = vmul.f32 %v1633_v13, %v911_v0  ;;  %1634 = vpow2.f32 %v1458_v12  ;;  %vm1087_vm10 = vweird.f32 %v1633_v13  ;;  %v1074_v29 = vsel %vm1950_vm11, %v1629_v61, %v1070_v18 }
 0x23c   : > { %1636 = vrcp.f32 %v1943_v14  ;;  %v776_v17 = vpop.f32.mrf.mxu2  ;;  %vm1088_vm14 = vmor %vm1086_vm12, %vm1087_vm10  ;;  %v1079_v38 = vsel %vm1076_vm13, %v1078_v33, %v1074_v29  ;;  %vm1101_vm1 = vweird.f32 %v1943_v14  ;;  %v1107_v54 = vand.u32 2147483648, %v1943_v14 }
 0x23d   : > { %v1083_v19 = vsub.f32 1.0, %v1082_v16  ;;  %v777_v20 = vadd.f32 %v776_v17, %v727_v15  ;;  %v1105_v56 = vand.u32 2147483647, %v1943_v14 }
 0x23e   : > { %v1108_v63 = vor.u32 1.1754944e-38, %v1107_v54 }
 0x23f   : > { %v1084_v24 = vmul.f32 %v1633_v13, %v1083_v19  ;;  %v850_v26 = vadd.f32 %v1854_v58, %v777_v20  ;;  %vm1106_vm6 = vcmp.eq.f32.partialorder %v1105_v56, 8.507059e+37 }
 0x241   : > { %v1635_v28 = vpop.eup %1634  ;;  %v1085_v30 = vadd.f32 %v1633_v13, %v1084_v24  ;;  %v1459_v31 = vmul.f32 -1.442695, %v850_v26 }
 0x242   : > { %v1637_v32 = vpop.eup %1636  ;;  %v913_v35 = vadd.f32 1.0, %v1635_v28 }
 0x243   : > { %v1089_v36 = vsel %vm1088_vm14, %v1633_v13, %v1085_v30  ;;  %v1097_v37 = vmul.f32 %v1637_v32, %v1943_v14  ;;  %1638 = vpow2.f32 %v1459_v31  ;;  %vm1102_vm0 = vweird.f32 %v1637_v32 }
 0x244   : > { %v1094_v39 = vsel %vm1091_vm15, %v1093_v34, %v1089_v36  ;;  %1640 = vrcp.f32 %v913_v35  ;;  %v778_v41 = vpop.f32.mrf.mxu2  ;;  %v1122_v55 = vand.u32 2147483648, %v913_v35  ;;  %vm1103_vm3 = vmor %vm1101_vm1, %vm1102_vm0  ;;  %vm1116_vm4 = vweird.f32 %v913_v35 }
 0x245   : > { %v1532_v42 = vpack.c.bf16 %v1094_v39, %v1079_v38  ;;  %v1098_v43 = vsub.f32 1.0, %v1097_v37  ;;  %v779_v44 = vadd.f32 %v778_v41, %v729_v40 }
 0x246   : > { %v1123_v0 = vor.u32 1.1754944e-38, %v1122_v55 }
 0x247   : > { %1548 = vst [vmem:[%s1875_s6 + $0x28] sm:$0xff] %v1532_v42   ;;  %v851_v45 = vadd.f32 %v1854_v58, %v779_v44  ;;  %v1099_v47 = vmul.f32 %v1637_v32, %v1098_v43  ;;  %v1120_v58 = vand.u32 2147483647, %v913_v35 }
 0x249   : > { %v1639_v46 = vpop.eup %1638  ;;  %v1460_v48 = vmul.f32 -1.442695, %v851_v45  ;;  %v1100_v52 = vadd.f32 %v1637_v32, %v1099_v47  ;;  %vm1121_vm7 = vcmp.eq.f32.partialorder %v1120_v58, 8.507059e+37 }
 0x24a   : > { %v1641_v49 = vpop.eup %1640  ;;  %v914_v50 = vadd.f32 1.0, %v1639_v46 }
 0x24b   : > { %v1112_v51 = vmul.f32 %v1641_v49, %v913_v35  ;;  %1642 = vpow2.f32 %v1460_v48  ;;  %vm1117_vm2 = vweird.f32 %v1641_v49  ;;  %v1104_v60 = vsel %vm1103_vm3, %v1637_v32, %v1100_v52 }
 0x24c   : > { %1644 = vrcp.f32 %v914_v50  ;;  %vm1118_vm5 = vmor %vm1116_vm4, %vm1117_vm2  ;;  %v1109_v4 = vsel %vm1106_vm6, %v1108_v63, %v1104_v60  ;;  %vm1131_vm9 = vweird.f32 %v914_v50  ;;  %v1137_v13 = vand.u32 2147483648, %v914_v50 }
 0x24d   : > { %v1113_v53 = vsub.f32 1.0, %v1112_v51  ;;  %v1135_v15 = vand.u32 2147483647, %v914_v50 }
 0x24e   : > { %v1138_v20 = vor.u32 1.1754944e-38, %v1137_v13 }
 0x24f   : > { %v1114_v57 = vmul.f32 %v1641_v49, %v1113_v53  ;;  %vm1136_vm14 = vcmp.eq.f32.partialorder %v1135_v15, 8.507059e+37 }
 0x251   : > { %v1643_v59 = vpop.eup %1642  ;;  %v1115_v61 = vadd.f32 %v1641_v49, %v1114_v57 }
 0x252   : > { %v1645_v62 = vpop.eup %1644  ;;  %v915_v1 = vadd.f32 1.0, %v1643_v59 }
 0x253   : > { %v1119_v2 = vsel %vm1118_vm5, %v1641_v49, %v1115_v61  ;;  %v1127_v3 = vmul.f32 %v1645_v62, %v914_v50  ;;  %vm1132_vm8 = vweird.f32 %v1645_v62 }
 0x254   : > { %v1124_v5 = vsel %vm1121_vm7, %v1123_v0, %v1119_v2  ;;  %1646 = vrcp.f32 %v915_v1  ;;  %v1152_v14 = vand.u32 2147483648, %v915_v1  ;;  %v1150_v17 = vand.u32 2147483647, %v915_v1  ;;  %vm1133_vm11 = vmor %vm1131_vm9, %vm1132_vm8 }
 0x255   : > { %v1537_v6 = vpack.c.bf16 %v1124_v5, %v1109_v4  ;;  %v1128_v7 = vsub.f32 1.0, %v1127_v3  ;;  %vm1146_vm12 = vweird.f32 %v915_v1 }
 0x256   : > { %v1153_v21 = vor.u32 1.1754944e-38, %v1152_v14  ;;  %vm1151_vm15 = vcmp.eq.f32.partialorder %v1150_v17, 8.507059e+37 }
 0x257   : > { %1549 = vst [vmem:[%s1875_s6 + $0x30] sm:$0xff] %v1537_v6   ;;  %v1129_v8 = vmul.f32 %v1645_v62, %v1128_v7 }
 0x259   : > { %v1130_v11 = vadd.f32 %v1645_v62, %v1129_v8 }
 0x25a   : > { %v1647_v9 = vpop.eup %1646 }
 0x25b   : > { %v1142_v10 = vmul.f32 %v1647_v9, %v915_v1  ;;  %vm1147_vm10 = vweird.f32 %v1647_v9  ;;  %v1134_v18 = vsel %vm1133_vm11, %v1645_v62, %v1130_v11 }
 0x25c   : > { %vm1148_vm13 = vmor %vm1146_vm12, %vm1147_vm10  ;;  %v1139_v23 = vsel %vm1136_vm14, %v1138_v20, %v1134_v18 }
 0x25d   : > { %v1143_v12 = vsub.f32 1.0, %v1142_v10 }
 0x25f   : > { %v1144_v16 = vmul.f32 %v1647_v9, %v1143_v12 }
 0x261   : > { %v1145_v19 = vadd.f32 %v1647_v9, %v1144_v16 }
 0x263   : > { %v1149_v22 = vsel %vm1148_vm13, %v1647_v9, %v1145_v19 }
 0x264   : > { %v1154_v24 = vsel %vm1151_vm15, %v1153_v21, %v1149_v22 }
 0x265   : > { %v1542_v25 = vpack.c.bf16 %v1154_v24, %v1139_v23 }
 0x267   : > { %1550 = vst [vmem:[%s1875_s6 + $0x38] sm:$0xff] %v1542_v25  }
 0x268 PF: > { %s14_s17 = sadd.s32 1, %s1670_s17   ;;  %s1990_s15 = smov %s1666_s16 }
 0x269   : > { %p11_p5 = scmp.ge.s32.totalorder %s14_s17, 4   ;;  %s1991_s16 = smov %s1993_s18 }
 0x26b   :  { %13 = sbr.rel (!%p11_p5) target bundleno = 2 (0x2), region = 77 }

</bundles_post_ra>
